<compile_context>
chip_gen: v5e
topology: v5e:2x2
jax: 0.10.0
libtpu: 0.0.40
codegen_flags: <defaults>
</compile_context>

<pallas_src>
import functools

import jax
import jax.numpy as jnp
from jax.experimental import pallas as pl
from jax.experimental.pallas import tpu as pltpu

ESM_DIM = 2560
CON_DIM = 2048
FEAT_DIM = ESM_DIM + CON_DIM  # 4608
LN_EPS = 1e-5                 # torch.nn.LayerNorm default


def _layernorm(h, gamma, beta):
    # Single-pass statistics (one sweep for sum and sum-of-squares), f32 math.
    mu = jnp.mean(h, axis=-1, keepdims=True)
    ms = jnp.mean(h * h, axis=-1, keepdims=True)
    var = jnp.maximum(ms - mu * mu, 0.0)
    return (h - mu) * jax.lax.rsqrt(var + LN_EPS) * gamma + beta


def layernormnet2_kernel(
    x_ref,                      # (tb, 4608) input tile (f32)
    w11_ref, w12_ref, b1_ref,   # fc1_1 (2560,H), fc1_2 (2048,H), concat bias (1,2H)
    g1_ref, be1_ref,            # ln1 affine (1,2H)
    w2_ref, b2_ref,             # fc2 (2H,H), (1,H)
    g2_ref, be2_ref,            # ln2 affine (1,H)
    w3_ref, b3_ref,             # fc3 (H,O_pad), (1,O_pad)  -- lane-padded
    o_ref,                      # (tb, O_pad) f32
):
    cd = w11_ref.dtype  # matmul compute dtype (bf16 by default)
    x = x_ref[...]
    esm = x[:, :ESM_DIM].astype(cd)
    con = x[:, ESM_DIM:].astype(cd)

    # fc1_1(esm) ++ fc1_2(con)  ->  (tb, 2H), f32 accumulation on the MXU.
    h1 = jnp.dot(esm, w11_ref[...], preferred_element_type=jnp.float32)
    h2 = jnp.dot(con, w12_ref[...], preferred_element_type=jnp.float32)
    h = jnp.concatenate([h1, h2], axis=-1) + b1_ref[...]

    # ln1 -> (dropout = identity) -> relu
    h = jnp.maximum(_layernorm(h, g1_ref[...], be1_ref[...]), 0.0)

    # fc2 -> ln2 -> (dropout = identity) -> relu
    h = jnp.dot(h.astype(cd), w2_ref[...], preferred_element_type=jnp.float32) + b2_ref[...]
    h = jnp.maximum(_layernorm(h, g2_ref[...], be2_ref[...]), 0.0)

    # fc3 (lane-dense padded output columns -> unmasked vector stores)
    o_ref[...] = (
        jnp.dot(h.astype(cd), w3_ref[...], preferred_element_type=jnp.float32)
        + b3_ref[...]
    ).astype(o_ref.dtype)


def _choose_batch_tile(B, batch_tile):
    """Batch tile that is a multiple of 8 (or == B) and, when the batch allows,
    yields >= 2 grid steps so both v7x TensorCores get work."""
    if B <= 8:
        return B
    tb = min(batch_tile, (B // 8) * 8)
    if -(-B // tb) < 2 and tb >= 16:
        tb = ((tb // 2 + 7) // 8) * 8
    return max(tb, 8)


@functools.partial(jax.jit, static_argnames=("batch_tile", "compute_dtype"))
def layernormnet2_forward(x, params, *, batch_tile=256, compute_dtype=jnp.bfloat16):
    B, F = x.shape
    assert F == FEAT_DIM, f"expected {FEAT_DIM} input features, got {F}"
    H = params["w2"].shape[1]
    assert params["w2"].shape[0] == 2 * H
    assert params["w1_1"].shape == (ESM_DIM, H) and params["w1_2"].shape == (CON_DIM, H)
    O = params["w3"].shape[1]
    O_pad = max(128, pl.cdiv(O, 128) * 128)

    cd = compute_dtype
    # One-time, tiny param prep: cast matmul weights to the compute dtype,
    # pre-concatenate the fc1 biases, zero-pad fc3 to a lane-dense width.
    w11 = params["w1_1"].astype(cd)
    w12 = params["w1_2"].astype(cd)
    b1 = jnp.concatenate([params["b1_1"], params["b1_2"]], axis=-1).astype(jnp.float32)
    w2 = params["w2"].astype(cd)
    w3 = params["w3"].astype(cd)
    b3 = params["b3"].astype(jnp.float32)
    if O_pad != O:
        w3 = jnp.pad(w3, ((0, 0), (0, O_pad - O)))
        b3 = jnp.pad(b3, ((0, 0), (0, O_pad - O)))

    tb = _choose_batch_tile(B, batch_tile)
    grid = (pl.cdiv(B, tb),)

    def batch_spec(feat):
        return pl.BlockSpec((tb, feat), lambda i: (i, 0))

    def full_spec(shape):
        return pl.BlockSpec(shape, lambda i: (0, 0))

    # NOTE: for much larger hidden_dim, the whole-weight blocks below should be
    # tiled over K (reduction grid axis marked "arbitrary" or an inner
    # pltpu.emit_pipeline) to stay inside v7x's 64 MiB VMEM.
    out = pl.pallas_call(
        layernormnet2_kernel,
        out_shape=jax.ShapeDtypeStruct((B, O_pad), jnp.float32),
        grid_spec=pltpu.PrefetchScalarGridSpec(
            num_scalar_prefetch=0,
            grid=grid,
            in_specs=[
                batch_spec(FEAT_DIM),        # x (unsliced; split in-kernel)
                full_spec((ESM_DIM, H)),     # w1_1
                full_spec((CON_DIM, H)),     # w1_2
                full_spec((1, 2 * H)),       # b1 = concat(b1_1, b1_2)
                full_spec((1, 2 * H)),       # ln1 gamma
                full_spec((1, 2 * H)),       # ln1 beta
                full_spec((2 * H, H)),       # w2
                full_spec((1, H)),           # b2
                full_spec((1, H)),           # ln2 gamma
                full_spec((1, H)),           # ln2 beta
                full_spec((H, O_pad)),       # w3 (lane-padded)
                full_spec((1, O_pad)),       # b3 (lane-padded)
            ],
            out_specs=pl.BlockSpec((tb, O_pad), lambda i: (i, 0)),
        ),
        compiler_params=pltpu.CompilerParams(
            dimension_semantics=("parallel",),
            vmem_limit_bytes=48 * 1024 * 1024,  # fits v7x's 64 MiB physical VMEM
        ),
    )(
        x,
        w11, w12, b1,
        params["g1"].astype(jnp.float32), params["be1"].astype(jnp.float32),
        w2, params["b2"].astype(jnp.float32),
        params["g2"].astype(jnp.float32), params["be2"].astype(jnp.float32),
        w3, b3,
    )
    return out[:, :O] if O_pad != O else out


def init_params(key, hidden_dim, out_dim):
    ks = jax.random.split(key, 12)
    s = 0.02
    H, O = hidden_dim, out_dim
    return {
        # Linear weights stored as (in, out):  x @ W  ==  torch's  x @ W.T
        "w1_1": s * jax.random.normal(ks[0], (ESM_DIM, H), jnp.float32),
        "b1_1": s * jax.random.normal(ks[1], (1, H), jnp.float32),
        "w1_2": s * jax.random.normal(ks[2], (CON_DIM, H), jnp.float32),
        "b1_2": s * jax.random.normal(ks[3], (1, H), jnp.float32),
        "g1": 1.0 + s * jax.random.normal(ks[4], (1, 2 * H), jnp.float32),
        "be1": s * jax.random.normal(ks[5], (1, 2 * H), jnp.float32),
        "w2": s * jax.random.normal(ks[6], (2 * H, H), jnp.float32),
        "b2": s * jax.random.normal(ks[7], (1, H), jnp.float32),
        "g2": 1.0 + s * jax.random.normal(ks[8], (1, H), jnp.float32),
        "be2": s * jax.random.normal(ks[9], (1, H), jnp.float32),
        "w3": s * jax.random.normal(ks[10], (H, O), jnp.float32),
        "b3": s * jax.random.normal(ks[11], (1, O), jnp.float32),
    }


def _reference_forward(x, params, compute_dtype=jnp.bfloat16):
    """Pure-JAX reference with the same matmul precision policy as the kernel."""
    cd = compute_dtype

    def mm(a, w):
        return jnp.dot(a.astype(cd), w.astype(cd), preferred_element_type=jnp.float32)

    def ln(h, g, b):
        mu = jnp.mean(h, axis=-1, keepdims=True)
        var = jnp.mean(jnp.square(h - mu), axis=-1, keepdims=True)
        return (h - mu) * jax.lax.rsqrt(var + LN_EPS) * g + b

    esm, con = x[:, :ESM_DIM], x[:, ESM_DIM:]
    h = jnp.concatenate(
        [mm(esm, params["w1_1"]) + params["b1_1"],
         mm(con, params["w1_2"]) + params["b1_2"]],
        axis=-1,
    )
    h = jnp.maximum(ln(h, params["g1"], params["be1"]), 0.0)
    h = mm(h, params["w2"]) + params["b2"]
    h = jnp.maximum(ln(h, params["g2"], params["be2"]), 0.0)
    return mm(h, params["w3"]) + params["b3"]


if __name__ == "__main__":
    # Small shapes consistent with the module: feature dims are fixed (2560+2048),
    # hidden/out kept small.  B=40 is not divisible by the chosen tile (24), so
    # the run exercises a multi-step grid with a masked partial last block.
    B = 40
    HIDDEN = 128
    OUT = 64

    key = jax.random.PRNGKey(0)
    k_x, k_p = jax.random.split(key)
    x = jax.random.normal(k_x, (B, FEAT_DIM), jnp.float32)
    params = init_params(k_p, HIDDEN, OUT)

    out = layernormnet2_forward(x, params)  # bf16 matmuls, f32 LN/bias/relu
    out = jax.block_until_ready(out)

    ref = _reference_forward(x, params, compute_dtype=jnp.bfloat16)
    assert out.shape == (B, OUT), out.shape
    max_err = float(jnp.max(jnp.abs(out - ref)))
    assert jnp.allclose(out, ref, atol=2e-2, rtol=2e-2), max_err

    print("KERNEL_OK")
</pallas_src>

<mosaic_0001>
module attributes {stable_mosaic.version = 11 : i64} {
  func.func @layernormnet2_kernel(%arg0: i32, %arg1: memref<24x4608xf32, #tpu.memory_space<vmem>>, %arg2: memref<2560x128xbf16, #tpu.memory_space<vmem>>, %arg3: memref<2048x128xbf16, #tpu.memory_space<vmem>>, %arg4: memref<1x256xf32, #tpu.memory_space<vmem>>, %arg5: memref<1x256xf32, #tpu.memory_space<vmem>>, %arg6: memref<1x256xf32, #tpu.memory_space<vmem>>, %arg7: memref<256x128xbf16, #tpu.memory_space<vmem>>, %arg8: memref<1x128xf32, #tpu.memory_space<vmem>>, %arg9: memref<1x128xf32, #tpu.memory_space<vmem>>, %arg10: memref<1x128xf32, #tpu.memory_space<vmem>>, %arg11: memref<128x128xbf16, #tpu.memory_space<vmem>>, %arg12: memref<1x128xf32, #tpu.memory_space<vmem>>, %arg13: memref<24x128xf32, #tpu.memory_space<vmem>>) attributes {dimension_semantics = [#tpu.dimension_semantics<parallel>], iteration_bounds = array<i64: 2>, scalar_prefetch = 0 : i64, scratch_operands = 0 : i64, tpu.core_type = #tpu.core_type<tc>, window_params = [{transform_indices = @transform_0, window_bounds = array<i64: 24, 4608>}, {pipeline_mode = #tpu.pipeline_mode<synchronous>, transform_indices = @transform_1, window_bounds = array<i64: 2560, 128>}, {pipeline_mode = #tpu.pipeline_mode<synchronous>, transform_indices = @transform_2, window_bounds = array<i64: 2048, 128>}, {pipeline_mode = #tpu.pipeline_mode<synchronous>, transform_indices = @transform_3, window_bounds = array<i64: 1, 256>}, {pipeline_mode = #tpu.pipeline_mode<synchronous>, transform_indices = @transform_4, window_bounds = array<i64: 1, 256>}, {pipeline_mode = #tpu.pipeline_mode<synchronous>, transform_indices = @transform_5, window_bounds = array<i64: 1, 256>}, {pipeline_mode = #tpu.pipeline_mode<synchronous>, transform_indices = @transform_6, window_bounds = array<i64: 256, 128>}, {pipeline_mode = #tpu.pipeline_mode<synchronous>, transform_indices = @transform_7, window_bounds = array<i64: 1, 128>}, {pipeline_mode = #tpu.pipeline_mode<synchronous>, transform_indices = @transform_8, window_bounds = array<i64: 1, 128>}, {pipeline_mode = #tpu.pipeline_mode<synchronous>, transform_indices = @transform_9, window_bounds = array<i64: 1, 128>}, {pipeline_mode = #tpu.pipeline_mode<synchronous>, transform_indices = @transform_10, window_bounds = array<i64: 128, 128>}, {pipeline_mode = #tpu.pipeline_mode<synchronous>, transform_indices = @transform_11, window_bounds = array<i64: 1, 128>}, {transform_indices = @transform_12, window_bounds = array<i64: 24, 128>}]} {
    %c0 = arith.constant 0 : index
    %c0_0 = arith.constant 0 : index
    %0 = vector.load %arg1[%c0, %c0_0] : memref<24x4608xf32, #tpu.memory_space<vmem>>, vector<24x4608xf32>
    %1 = vector.extract_strided_slice %0 {offsets = [0, 0], sizes = [24, 2560], strides = [1, 1]} : vector<24x4608xf32> to vector<24x2560xf32>
    %2 = arith.truncf %1 : vector<24x2560xf32> to vector<24x2560xbf16>
    %3 = vector.extract_strided_slice %0 {offsets = [0, 2560], sizes = [24, 2048], strides = [1, 1]} : vector<24x4608xf32> to vector<24x2048xf32>
    %4 = arith.truncf %3 : vector<24x2048xf32> to vector<24x2048xbf16>
    %c0_1 = arith.constant 0 : index
    %c0_2 = arith.constant 0 : index
    %5 = vector.load %arg2[%c0_1, %c0_2] : memref<2560x128xbf16, #tpu.memory_space<vmem>>, vector<2560x128xbf16>
    %cst = arith.constant dense<0.000000e+00> : vector<24x128xf32>
    %6 = tpu.matmul %2, %5, %cst {dimension_numbers = #tpu.dot_dimension_numbers<[1], [0], [0], [1], [0, 0, 1, 1], [], []>} : vector<24x2560xbf16>, vector<2560x128xbf16>, vector<24x128xf32> -> vector<24x128xf32>
    %c0_3 = arith.constant 0 : index
    %c0_4 = arith.constant 0 : index
    %7 = vector.load %arg3[%c0_3, %c0_4] : memref<2048x128xbf16, #tpu.memory_space<vmem>>, vector<2048x128xbf16>
    %cst_5 = arith.constant dense<0.000000e+00> : vector<24x128xf32>
    %8 = tpu.matmul %4, %7, %cst_5 {dimension_numbers = #tpu.dot_dimension_numbers<[1], [0], [0], [1], [0, 0, 1, 1], [], []>} : vector<24x2048xbf16>, vector<2048x128xbf16>, vector<24x128xf32> -> vector<24x128xf32>
    %9 = tpu.concatenate %6, %8 in 1 : vector<24x128xf32>, vector<24x128xf32> -> vector<24x256xf32>
    %c0_6 = arith.constant 0 : index
    %c0_7 = arith.constant 0 : index
    %10 = vector.load %arg4[%c0_6, %c0_7] : memref<1x256xf32, #tpu.memory_space<vmem>>, vector<1x256xf32>
    %11 = vector.broadcast %10 : vector<1x256xf32> to vector<24x256xf32>
    %12 = arith.addf %9, %11 : vector<24x256xf32>
    %c0_8 = arith.constant 0 : index
    %c0_9 = arith.constant 0 : index
    %13 = vector.load %arg5[%c0_8, %c0_9] : memref<1x256xf32, #tpu.memory_space<vmem>>, vector<1x256xf32>
    %c0_10 = arith.constant 0 : index
    %c0_11 = arith.constant 0 : index
    %14 = vector.load %arg6[%c0_10, %c0_11] : memref<1x256xf32, #tpu.memory_space<vmem>>, vector<1x256xf32>
    %cst_12 = arith.constant dense<0.000000e+00> : vector<24xf32>
    %15 = vector.multi_reduction <add>, %12, %cst_12 [1] : vector<24x256xf32> to vector<24xf32>
    %16 = vector.shape_cast %15 : vector<24xf32> to vector<24x1xf32>
    %cst_13 = arith.constant 2.560000e+02 : f32
    %17 = vector.broadcast %cst_13 : f32 to vector<24x1xf32>
    %18 = arith.divf %16, %17 : vector<24x1xf32>
    %19 = arith.mulf %12, %12 : vector<24x256xf32>
    %cst_14 = arith.constant dense<0.000000e+00> : vector<24xf32>
    %20 = vector.multi_reduction <add>, %19, %cst_14 [1] : vector<24x256xf32> to vector<24xf32>
    %21 = vector.shape_cast %20 : vector<24xf32> to vector<24x1xf32>
    %cst_15 = arith.constant 2.560000e+02 : f32
    %22 = vector.broadcast %cst_15 : f32 to vector<24x1xf32>
    %23 = arith.divf %21, %22 : vector<24x1xf32>
    %24 = arith.mulf %18, %18 : vector<24x1xf32>
    %25 = arith.subf %23, %24 : vector<24x1xf32>
    %cst_16 = arith.constant 0.000000e+00 : f32
    %26 = vector.broadcast %cst_16 : f32 to vector<24x1xf32>
    %27 = arith.maximumf %25, %26 : vector<24x1xf32>
    %28 = vector.broadcast %18 : vector<24x1xf32> to vector<24x256xf32>
    %29 = arith.subf %12, %28 : vector<24x256xf32>
    %cst_17 = arith.constant 9.99999974E-6 : f32
    %30 = vector.broadcast %cst_17 : f32 to vector<24x1xf32>
    %31 = arith.addf %27, %30 : vector<24x1xf32>
    %32 = math.rsqrt %31 : vector<24x1xf32>
    %33 = vector.broadcast %32 : vector<24x1xf32> to vector<24x256xf32>
    %34 = arith.mulf %29, %33 : vector<24x256xf32>
    %35 = vector.broadcast %13 : vector<1x256xf32> to vector<24x256xf32>
    %36 = arith.mulf %34, %35 : vector<24x256xf32>
    %37 = vector.broadcast %14 : vector<1x256xf32> to vector<24x256xf32>
    %38 = arith.addf %36, %37 : vector<24x256xf32>
    %cst_18 = arith.constant 0.000000e+00 : f32
    %39 = vector.broadcast %cst_18 : f32 to vector<24x256xf32>
    %40 = arith.maximumf %38, %39 : vector<24x256xf32>
    %41 = arith.truncf %40 : vector<24x256xf32> to vector<24x256xbf16>
    %c0_19 = arith.constant 0 : index
    %c0_20 = arith.constant 0 : index
    %42 = vector.load %arg7[%c0_19, %c0_20] : memref<256x128xbf16, #tpu.memory_space<vmem>>, vector<256x128xbf16>
    %cst_21 = arith.constant dense<0.000000e+00> : vector<24x128xf32>
    %43 = tpu.matmul %41, %42, %cst_21 {dimension_numbers = #tpu.dot_dimension_numbers<[1], [0], [0], [1], [0, 0, 1, 1], [], []>} : vector<24x256xbf16>, vector<256x128xbf16>, vector<24x128xf32> -> vector<24x128xf32>
    %c0_22 = arith.constant 0 : index
    %c0_23 = arith.constant 0 : index
    %44 = vector.load %arg8[%c0_22, %c0_23] : memref<1x128xf32, #tpu.memory_space<vmem>>, vector<1x128xf32>
    %45 = vector.broadcast %44 : vector<1x128xf32> to vector<24x128xf32>
    %46 = arith.addf %43, %45 : vector<24x128xf32>
    %c0_24 = arith.constant 0 : index
    %c0_25 = arith.constant 0 : index
    %47 = vector.load %arg9[%c0_24, %c0_25] : memref<1x128xf32, #tpu.memory_space<vmem>>, vector<1x128xf32>
    %c0_26 = arith.constant 0 : index
    %c0_27 = arith.constant 0 : index
    %48 = vector.load %arg10[%c0_26, %c0_27] : memref<1x128xf32, #tpu.memory_space<vmem>>, vector<1x128xf32>
    %cst_28 = arith.constant dense<0.000000e+00> : vector<24xf32>
    %49 = vector.multi_reduction <add>, %46, %cst_28 [1] : vector<24x128xf32> to vector<24xf32>
    %50 = vector.shape_cast %49 : vector<24xf32> to vector<24x1xf32>
    %cst_29 = arith.constant 1.280000e+02 : f32
    %51 = vector.broadcast %cst_29 : f32 to vector<24x1xf32>
    %52 = arith.divf %50, %51 : vector<24x1xf32>
    %53 = arith.mulf %46, %46 : vector<24x128xf32>
    %cst_30 = arith.constant dense<0.000000e+00> : vector<24xf32>
    %54 = vector.multi_reduction <add>, %53, %cst_30 [1] : vector<24x128xf32> to vector<24xf32>
    %55 = vector.shape_cast %54 : vector<24xf32> to vector<24x1xf32>
    %cst_31 = arith.constant 1.280000e+02 : f32
    %56 = vector.broadcast %cst_31 : f32 to vector<24x1xf32>
    %57 = arith.divf %55, %56 : vector<24x1xf32>
    %58 = arith.mulf %52, %52 : vector<24x1xf32>
    %59 = arith.subf %57, %58 : vector<24x1xf32>
    %cst_32 = arith.constant 0.000000e+00 : f32
    %60 = vector.broadcast %cst_32 : f32 to vector<24x1xf32>
    %61 = arith.maximumf %59, %60 : vector<24x1xf32>
    %62 = vector.broadcast %52 : vector<24x1xf32> to vector<24x128xf32>
    %63 = arith.subf %46, %62 : vector<24x128xf32>
    %cst_33 = arith.constant 9.99999974E-6 : f32
    %64 = vector.broadcast %cst_33 : f32 to vector<24x1xf32>
    %65 = arith.addf %61, %64 : vector<24x1xf32>
    %66 = math.rsqrt %65 : vector<24x1xf32>
    %67 = vector.broadcast %66 : vector<24x1xf32> to vector<24x128xf32>
    %68 = arith.mulf %63, %67 : vector<24x128xf32>
    %69 = vector.broadcast %47 : vector<1x128xf32> to vector<24x128xf32>
    %70 = arith.mulf %68, %69 : vector<24x128xf32>
    %71 = vector.broadcast %48 : vector<1x128xf32> to vector<24x128xf32>
    %72 = arith.addf %70, %71 : vector<24x128xf32>
    %cst_34 = arith.constant 0.000000e+00 : f32
    %73 = vector.broadcast %cst_34 : f32 to vector<24x128xf32>
    %74 = arith.maximumf %72, %73 : vector<24x128xf32>
    %75 = arith.truncf %74 : vector<24x128xf32> to vector<24x128xbf16>
    %c0_35 = arith.constant 0 : index
    %c0_36 = arith.constant 0 : index
    %76 = vector.load %arg11[%c0_35, %c0_36] : memref<128x128xbf16, #tpu.memory_space<vmem>>, vector<128x128xbf16>
    %cst_37 = arith.constant dense<0.000000e+00> : vector<24x128xf32>
    %77 = tpu.matmul %75, %76, %cst_37 {dimension_numbers = #tpu.dot_dimension_numbers<[1], [0], [0], [1], [0, 0, 1, 1], [], []>} : vector<24x128xbf16>, vector<128x128xbf16>, vector<24x128xf32> -> vector<24x128xf32>
    %c0_38 = arith.constant 0 : index
    %c0_39 = arith.constant 0 : index
    %78 = vector.load %arg12[%c0_38, %c0_39] : memref<1x128xf32, #tpu.memory_space<vmem>>, vector<1x128xf32>
    %79 = vector.broadcast %78 : vector<1x128xf32> to vector<24x128xf32>
    %80 = arith.addf %77, %79 : vector<24x128xf32>
    %c0_40 = arith.constant 0 : index
    %c0_41 = arith.constant 0 : index
    %81 = vector.load %arg13[%c0_40, %c0_41] : memref<24x128xf32, #tpu.memory_space<vmem>>, vector<24x128xf32>
    tpu.vector_store %arg13[%c0_40, %c0_41], %80 {strides = array<i32>} : memref<24x128xf32, #tpu.memory_space<vmem>>, vector<24x128xf32>,
    return
  }
  func.func @transform_0(%arg0: i32) -> (i32, i32) {
    %c0_i32 = arith.constant 0 : i32
    %c0_i32_0 = arith.constant 0 : i32
    return %arg0, %c0_i32 : i32, i32
  }
  func.func @transform_1(%arg0: i32) -> (i32, i32) {
    %c0_i32 = arith.constant 0 : i32
    %c0_i32_0 = arith.constant 0 : i32
    %c0_i32_1 = arith.constant 0 : i32
    return %c0_i32, %c0_i32_0 : i32, i32
  }
  func.func @transform_2(%arg0: i32) -> (i32, i32) {
    %c0_i32 = arith.constant 0 : i32
    %c0_i32_0 = arith.constant 0 : i32
    %c0_i32_1 = arith.constant 0 : i32
    return %c0_i32, %c0_i32_0 : i32, i32
  }
  func.func @transform_3(%arg0: i32) -> (i32, i32) {
    %c0_i32 = arith.constant 0 : i32
    %c0_i32_0 = arith.constant 0 : i32
    %c0_i32_1 = arith.constant 0 : i32
    return %c0_i32, %c0_i32_0 : i32, i32
  }
  func.func @transform_4(%arg0: i32) -> (i32, i32) {
    %c0_i32 = arith.constant 0 : i32
    %c0_i32_0 = arith.constant 0 : i32
    %c0_i32_1 = arith.constant 0 : i32
    return %c0_i32, %c0_i32_0 : i32, i32
  }
  func.func @transform_5(%arg0: i32) -> (i32, i32) {
    %c0_i32 = arith.constant 0 : i32
    %c0_i32_0 = arith.constant 0 : i32
    %c0_i32_1 = arith.constant 0 : i32
    return %c0_i32, %c0_i32_0 : i32, i32
  }
  func.func @transform_6(%arg0: i32) -> (i32, i32) {
    %c0_i32 = arith.constant 0 : i32
    %c0_i32_0 = arith.constant 0 : i32
    %c0_i32_1 = arith.constant 0 : i32
    return %c0_i32, %c0_i32_0 : i32, i32
  }
  func.func @transform_7(%arg0: i32) -> (i32, i32) {
    %c0_i32 = arith.constant 0 : i32
    %c0_i32_0 = arith.constant 0 : i32
    %c0_i32_1 = arith.constant 0 : i32
    return %c0_i32, %c0_i32_0 : i32, i32
  }
  func.func @transform_8(%arg0: i32) -> (i32, i32) {
    %c0_i32 = arith.constant 0 : i32
    %c0_i32_0 = arith.constant 0 : i32
    %c0_i32_1 = arith.constant 0 : i32
    return %c0_i32, %c0_i32_0 : i32, i32
  }
  func.func @transform_9(%arg0: i32) -> (i32, i32) {
    %c0_i32 = arith.constant 0 : i32
    %c0_i32_0 = arith.constant 0 : i32
    %c0_i32_1 = arith.constant 0 : i32
    return %c0_i32, %c0_i32_0 : i32, i32
  }
  func.func @transform_10(%arg0: i32) -> (i32, i32) {
    %c0_i32 = arith.constant 0 : i32
    %c0_i32_0 = arith.constant 0 : i32
    %c0_i32_1 = arith.constant 0 : i32
    return %c0_i32, %c0_i32_0 : i32, i32
  }
  func.func @transform_11(%arg0: i32) -> (i32, i32) {
    %c0_i32 = arith.constant 0 : i32
    %c0_i32_0 = arith.constant 0 : i32
    %c0_i32_1 = arith.constant 0 : i32
    return %c0_i32, %c0_i32_0 : i32, i32
  }
  func.func @transform_12(%arg0: i32) -> (i32, i32) {
    %c0_i32 = arith.constant 0 : i32
    %c0_i32_0 = arith.constant 0 : i32
    return %arg0, %c0_i32 : i32, i32
  }
}

</mosaic_0001>

<bundles_post_ra>
// kernel: layernormnet2_forward.1
= control target key start
LH: loop header
LB: loop body
LE: loop exit
PB: predicated region body
PF: predicated region fallthrough
CT: control target
= control target key end

     0   :  { %s7235_s0 = inlined_call_operand.vmem [shape: f32[40,4608], index: 0, kind: input, shape index: {}]   ;;  %s7236_s1 = inlined_call_operand.vmem [shape: bf16[2560,128], index: 1, kind: input, shape index: {}]   ;;  %s7237_s2 = inlined_call_operand.vmem [shape: bf16[2048,128], index: 2, kind: input, shape index: {}]   ;;  %s7238_s3 = inlined_call_operand.vmem [shape: f32[1,256], index: 3, kind: input, shape index: {}]   ;;  %s7239_s4 = inlined_call_operand.vmem [shape: f32[1,256], index: 4, kind: input, shape index: {}]   ;;  %s7240_s5 = inlined_call_operand.vmem [shape: f32[1,256], index: 5, kind: input, shape index: {}]   ;;  %s7241_s6 = inlined_call_operand.vmem [shape: bf16[256,128], index: 6, kind: input, shape index: {}]   ;;  %s7242_s7 = inlined_call_operand.vmem [shape: f32[1,128], index: 7, kind: input, shape index: {}]   ;;  %s7243_s8 = inlined_call_operand.vmem [shape: f32[1,128], index: 8, kind: input, shape index: {}]   ;;  %s7244_s9 = inlined_call_operand.vmem [shape: f32[1,128], index: 9, kind: input, shape index: {}]   ;;  %s7245_s10 = inlined_call_operand.vmem [shape: bf16[128,128], index: 10, kind: input, shape index: {}]   ;;  %s7246_s11 = inlined_call_operand.vmem [shape: f32[1,128], index: 11, kind: input, shape index: {}]   ;;  %s7247_s12 = inlined_call_operand.hbm [shape: f32[40,128], index: 12, kind: output, shape index: {}]  }
   0x1   :  { %7253 = sst [smem:[#allocation9_spill]] %s7235_s0 }
   0x2   :  { %17 = vsyncpa [#allocation3], 0 }
   0x3   :  { %19 = vsyncpa [#allocation3 + $0x1], 0  ;;  %s5943_s21 = smov 0   ;;  %s5945_s22 = smov 0  }
   0x4   :  { %s5947_s23 = smov 0   ;;  %s5949_s24 = smov 0  }
   0x5 LB: > { %7254 = sst [smem:[#allocation5_spill]] %s5867_s23  ;;  %s5964_s25 = sadd.s32 4294967295, %s5871_s24   ;;  %s5871_s24 = sphi %s5949_s24, %s7264_s24   ;;  %s5867_s23 = sphi %s5947_s23, %s7266_s23   ;;  %s5863_s22 = sphi %s5945_s22, %s7268_s22   ;;  %s5859_s21 = sphi %s5943_s21, %s7267_s21  }
   0x6   : > { %s4153_s26 = sadd.s32 4294967294, %s5871_s24   ;;  %s5968_s27 = sadd.s32 1, %s5871_s24  }
   0x7   : > { %7255 = sst [smem:[#allocation6_spill]] %s5968_s27  ;;  %s289_s28 = sadd.s32 1, %s5867_s23 }
   0x8   : > { %s286_s29 = ssub.s32 %s5871_s24, %s5968_s27  ;;  %p299_p0 = scmp.ne.s32.totalorder %s5867_s23, %s5863_s22 }
   0x9   : > { %p287_p1 = scmp.eq.s32.totalorder %s286_s29, 0  ;;  %p300_p2 = scmp.eq.s32.totalorder %s5964_s25, 1 }
   0xa   : > { %p305_p3 = scmp.ne.s32.totalorder %s5863_s22, %s5859_s21  ;;  %p306_p4 = scmp.eq.s32.totalorder %s4153_s26, 1 }
   0xb   : > { %s5979_s30 = scalar_select %p287_p1, %s5867_s23, %s289_s28  }
   0xc   : > { %p5981_p5 = por %p300_p2, %p299_p0  ;;  %p5985_p6 = por %p306_p4, %p305_p3 }
   0xd   : > { %7256 = sst [smem:[#allocation7_spill]] %s5979_s30  ;;  %p4156_p7 = scmp.ge.s32.totalorder %s5871_s24, 1 }
   0xe   : > { %s7258_s14 = scalar_select %p5985_p6, 1, 0 }
   0xf   : > { %p377_p8 = scmp.lt.s32.totalorder %s5871_s24, 3 }
  0x10   : > { %7259 = sst [smem:[#allocation8_spill]] %s7258_s14 }
  0x11   : > { %p378_p9 = pnand %p4156_p7, %p377_p8 }
  0x12   : > { %s6022_s15 = smul.u32 (!%p378_p9), 3, %s5964_s25  ;;  %s7260_s0 = sld [smem:[#allocation9_spill]] (!%p378_p9) }
  0x13   : > { %381 = sbr.rel (%p378_p9) target bundleno = 1096 (0x448), region = 68 }
  0x14   : > { %p431_p10 = scmp.lt.s32.totalorder (!%p378_p9), %s6022_s15, 4 }
  0x18   : > { %v5420_v0 = vld [vmem:[%s7236_s1 + $0x38] sm:$0xff]  ;;  %v5419_v4 = vld [vmem:[%s7236_s1 + $0x30] sm:$0xff]  ;;  %v5418_v8 = vld [vmem:[%s7236_s1 + $0x28] sm:$0xff]  ;;  %s432_s30 = scalar_select %p431_p10, %s6022_s15, 4 }
  0x19   : > { %v5428_v1 = vld [vmem:[%s7236_s1 + $0x78] sm:$0xff]  ;;  %1907 = vmatpush.bf16.msra.mxu0 %v5420_v0  ;;  %v5427_v5 = vld [vmem:[%s7236_s1 + $0x70] sm:$0xff]  ;;  %v5426_v9 = vld [vmem:[%s7236_s1 + $0x68] sm:$0xff]  ;;  %s4077_s26 = ssub.s32 (%p5981_p5), 5, %s6022_s15 }
  0x1a   : > { %v5436_v2 = vld [vmem:[%s7236_s1 + $0xb8] sm:$0xff]  ;;  %1925 = vmatpush.bf16.msra.mxu1 %v5428_v1  ;;  %v5435_v6 = vld [vmem:[%s7236_s1 + $0xb0] sm:$0xff]  ;;  %v5434_v10 = vld [vmem:[%s7236_s1 + $0xa8] sm:$0xff]  ;;  %s5735_s28 = smul.u32 288, %s432_s30  ;;  %p4078_p11 = scmp.lt.s32.totalorder (%p5981_p5), %s4077_s26, 3 }
  0x1b   : > { %v5444_v3 = vld [vmem:[%s7236_s1 + $0xf8] sm:$0xff]  ;;  %1943 = vmatpush.bf16.msra.mxu2 %v5436_v2  ;;  %v5443_v7 = vld [vmem:[%s7236_s1 + $0xf0] sm:$0xff]  ;;  %v5442_v11 = vld [vmem:[%s7236_s1 + $0xe8] sm:$0xff] }
  0x1c   : > { %1961 = vmatpush.bf16.msra.mxu3 %v5444_v3  ;;  %v5417_v12 = vld [vmem:[%s7236_s1 + $0x20] sm:$0xff]  ;;  %v5416_v16 = vld [vmem:[%s7236_s1 + $0x18] sm:$0xff]  ;;  %v5415_v20 = vld [vmem:[%s7236_s1 + $0x10] sm:$0xff]  ;;  %s6080_s23 = scalar_lea.vmem %s7260_s0, %s5735_s28 }
  0x1d   : > { %1908 = vmatpush.bf16.msra.mxu0 %v5419_v4  ;;  %v5425_v13 = vld [vmem:[%s7236_s1 + $0x60] sm:$0xff]  ;;  %v5424_v17 = vld [vmem:[%s7236_s1 + $0x58] sm:$0xff]  ;;  %v5423_v21 = vld [vmem:[%s7236_s1 + $0x50] sm:$0xff] }
  0x1e   : > { %1926 = vmatpush.bf16.msra.mxu1 %v5427_v5  ;;  %v5433_v14 = vld [vmem:[%s7236_s1 + $0xa0] sm:$0xff]  ;;  %v5432_v18 = vld [vmem:[%s7236_s1 + $0x98] sm:$0xff]  ;;  %v5431_v22 = vld [vmem:[%s7236_s1 + $0x90] sm:$0xff] }
  0x1f   : > { %1944 = vmatpush.bf16.msra.mxu2 %v5435_v6  ;;  %v5441_v15 = vld [vmem:[%s7236_s1 + $0xe0] sm:$0xff]  ;;  %v5440_v19 = vld [vmem:[%s7236_s1 + $0xd8] sm:$0xff]  ;;  %v5439_v23 = vld [vmem:[%s7236_s1 + $0xd0] sm:$0xff] }
  0x20   : > { %1962 = vmatpush.bf16.msra.mxu3 %v5443_v7  ;;  %v5414_v24 = vld [vmem:[%s7236_s1 + $0x8] sm:$0xff]  ;;  %v5413_v28 = vld [vmem:[%s7236_s1] sm:$0xff]  ;;  %v449_v36 = vld [vmem:[%s6080_s23 + $0x10] sm:$0xff] }
  0x21   : > { %1909 = vmatpush.bf16.msra.mxu0 %v5418_v8  ;;  %v5422_v25 = vld [vmem:[%s7236_s1 + $0x48] sm:$0xff]  ;;  %v5421_v29 = vld [vmem:[%s7236_s1 + $0x40] sm:$0xff]  ;;  %v485_v37 = vld [vmem:[%s6080_s23 + $0x130] sm:$0xff] }
  0x22   : > { %1927 = vmatpush.bf16.msra.mxu1 %v5426_v9  ;;  %v5430_v26 = vld [vmem:[%s7236_s1 + $0x88] sm:$0xff]  ;;  %v5429_v30 = vld [vmem:[%s7236_s1 + $0x80] sm:$0xff]  ;;  %v450_v38 = vld [vmem:[%s6080_s23 + $0x18] sm:$0xff]  ;;  %v557_v44 = vpack.c.bf16 %v485_v37, %v449_v36 }
  0x23   : > { %1945 = vmatpush.bf16.msra.mxu2 %v5434_v10  ;;  %v5438_v27 = vld [vmem:[%s7236_s1 + $0xc8] sm:$0xff]  ;;  %v5437_v31 = vld [vmem:[%s7236_s1 + $0xc0] sm:$0xff]  ;;  %v486_v39 = vld [vmem:[%s6080_s23 + $0x138] sm:$0xff] }
  0x24   : > { %1963 = vmatpush.bf16.msra.mxu3 %v5442_v11  ;;  %v447_v32 = vld [vmem:[%s6080_s23] sm:$0xff]  ;;  %v448_v34 = vld [vmem:[%s6080_s23 + $0x8] sm:$0xff]  ;;  %v5468_v40 = vld [vmem:[%s7236_s1 + $0x1b8] sm:$0xff]  ;;  %v558_v45 = vpack.c.bf16 %v486_v39, %v450_v38 }
  0x25   : > { %1910 = vmatpush.bf16.msra.mxu0 %v5417_v12  ;;  %v483_v33 = vld [vmem:[%s6080_s23 + $0x120] sm:$0xff]  ;;  %v484_v35 = vld [vmem:[%s6080_s23 + $0x128] sm:$0xff]  ;;  %v5452_v41 = vld [vmem:[%s7236_s1 + $0x138] sm:$0xff] }
  0x26   : > { %1928 = vmatpush.bf16.msra.mxu1 %v5425_v13  ;;  %v555_v42 = vpack.c.bf16 %v483_v33, %v447_v32  ;;  %v556_v43 = vpack.c.bf16 %v484_v35, %v448_v34  ;;  %v5460_v46 = vld [vmem:[%s7236_s1 + $0x178] sm:$0xff]  ;;  %v5467_v48 = vld [vmem:[%s7236_s1 + $0x1b0] sm:$0xff]  ;;  %v5466_v52 = vld [vmem:[%s7236_s1 + $0x1a8] sm:$0xff] }
  0x27   : > { %1946 = vmatpush.bf16.msra.mxu2 %v5433_v14  ;;  %v5476_v47 = vld [vmem:[%s7236_s1 + $0x1f8] sm:$0xff]  ;;  %v5451_v49 = vld [vmem:[%s7236_s1 + $0x130] sm:$0xff]  ;;  %v5450_v53 = vld [vmem:[%s7236_s1 + $0x128] sm:$0xff] }
  0x28   : > { %1964 = vmatpush.bf16.msra.mxu3 %v5441_v15  ;;  %v5459_v50 = vld [vmem:[%s7236_s1 + $0x170] sm:$0xff]  ;;  %v5458_v54 = vld [vmem:[%s7236_s1 + $0x168] sm:$0xff]  ;;  %v5465_v56 = vld [vmem:[%s7236_s1 + $0x1a0] sm:$0xff] }
  0x29   : > { %1911 = vmatpush.bf16.msra.mxu0 %v5416_v16  ;;  %v5475_v51 = vld [vmem:[%s7236_s1 + $0x1f0] sm:$0xff]  ;;  %v5474_v55 = vld [vmem:[%s7236_s1 + $0x1e8] sm:$0xff]  ;;  %v5449_v57 = vld [vmem:[%s7236_s1 + $0x120] sm:$0xff] }
  0x2a   : > { %1929 = vmatpush.bf16.msra.mxu1 %v5424_v17  ;;  %v5457_v58 = vld [vmem:[%s7236_s1 + $0x160] sm:$0xff]  ;;  %v520_v60 = vld [vmem:[%s6080_s23 + $0x248] sm:$0xff]  ;;  %v521_v62 = vld [vmem:[%s6080_s23 + $0x250] sm:$0xff] }
  0x2b   : > { %1947 = vmatpush.bf16.msra.mxu2 %v5432_v18  ;;  %v519_v59 = vld [vmem:[%s6080_s23 + $0x240] sm:$0xff]  ;;  %v522_v63 = vld [vmem:[%s6080_s23 + $0x258] sm:$0xff]  ;;  %v576_v3 = vpack.c.bf16 %v520_v60, %v520_v60  ;;  %v577_v4 = vpack.c.bf16 %v521_v62, %v521_v62  ;;  %v5463_v8 = vld [vmem:[%s7236_s1 + $0x190] sm:$0xff] }
  0x2c   : > { %1965 = vmatpush.bf16.msra.mxu3 %v5440_v19  ;;  %v5473_v61 = vld [vmem:[%s7236_s1 + $0x1e0] sm:$0xff]  ;;  %v5464_v0 = vld [vmem:[%s7236_s1 + $0x198] sm:$0xff]  ;;  %v575_v2 = vpack.c.bf16 %v519_v59, %v519_v59  ;;  %v578_v5 = vpack.c.bf16 %v522_v63, %v522_v63  ;;  %v5447_v9 = vld [vmem:[%s7236_s1 + $0x110] sm:$0xff] }
  0x2d   : > { %1912 = vmatpush.bf16.msra.mxu0 %v5415_v20  ;;  %v5448_v1 = vld [vmem:[%s7236_s1 + $0x118] sm:$0xff]  ;;  %v5455_v10 = vld [vmem:[%s7236_s1 + $0x150] sm:$0xff]  ;;  %v5462_v12 = vld [vmem:[%s7236_s1 + $0x188] sm:$0xff] }
  0x2e   : > { %1930 = vmatpush.bf16.msra.mxu1 %v5423_v21  ;;  %v5456_v6 = vld [vmem:[%s7236_s1 + $0x158] sm:$0xff]  ;;  %v5471_v11 = vld [vmem:[%s7236_s1 + $0x1d0] sm:$0xff]  ;;  %v5446_v13 = vld [vmem:[%s7236_s1 + $0x108] sm:$0xff] }
  0x2f   : > { %1948 = vmatpush.bf16.msra.mxu2 %v5431_v22  ;;  %v5472_v7 = vld [vmem:[%s7236_s1 + $0x1d8] sm:$0xff]  ;;  %v5454_v14 = vld [vmem:[%s7236_s1 + $0x148] sm:$0xff]  ;;  %v5461_v16 = vld [vmem:[%s7236_s1 + $0x180] sm:$0xff] }
  0x30   : > { %1966 = vmatpush.bf16.msra.mxu3 %v5439_v23  ;;  %v5470_v15 = vld [vmem:[%s7236_s1 + $0x1c8] sm:$0xff]  ;;  %v5445_v17 = vld [vmem:[%s7236_s1 + $0x100] sm:$0xff]  ;;  %v5500_v21 = vld [vmem:[%s7236_s1 + $0x2b8] sm:$0xff] }
  0x31   : > { %1913 = vmatpush.bf16.msra.mxu0 %v5414_v24  ;;  %v5453_v18 = vld [vmem:[%s7236_s1 + $0x140] sm:$0xff]  ;;  %v5484_v22 = vld [vmem:[%s7236_s1 + $0x238] sm:$0xff]  ;;  %v452_v24 = vld [vmem:[%s6080_s23 + $0x28] sm:$0xff] }
  0x32   : > { %1931 = vmatpush.bf16.msra.mxu1 %v5422_v25  ;;  %v5469_v19 = vld [vmem:[%s7236_s1 + $0x1c0] sm:$0xff]  ;;  %v488_v25 = vld [vmem:[%s6080_s23 + $0x148] sm:$0xff]  ;;  %v5499_v33 = vld [vmem:[%s7236_s1 + $0x2b0] sm:$0xff] }
  0x33   : > { %1949 = vmatpush.bf16.msra.mxu2 %v5430_v26  ;;  %v451_v20 = vld [vmem:[%s6080_s23 + $0x20] sm:$0xff]  ;;  %v453_v26 = vld [vmem:[%s6080_s23 + $0x30] sm:$0xff]  ;;  %v560_v34 = vpack.c.bf16 %v488_v25, %v452_v24 }
  0x34   : > { %1967 = vmatpush.bf16.msra.mxu3 %v5438_v27  ;;  %v487_v23 = vld [vmem:[%s6080_s23 + $0x140] sm:$0xff]  ;;  %v489_v27 = vld [vmem:[%s6080_s23 + $0x150] sm:$0xff] }
  0x35   : > { %1914 = vmatpush.bf16.msra.mxu0 %v5413_v28  ;;  %v454_v28 = vld [vmem:[%s6080_s23 + $0x38] sm:$0xff]  ;;  %v559_v32 = vpack.c.bf16 %v487_v23, %v451_v20  ;;  %v561_v35 = vpack.c.bf16 %v489_v27, %v453_v26  ;;  %v5483_v37 = vld [vmem:[%s7236_s1 + $0x230] sm:$0xff] }
  0x36   : > { %1932 = vmatpush.bf16.msra.mxu1 %v5421_v29  ;;  %v490_v29 = vld [vmem:[%s6080_s23 + $0x158] sm:$0xff]  ;;  %v5491_v38 = vld [vmem:[%s7236_s1 + $0x270] sm:$0xff] }
  0x37   : > { %1950 = vmatpush.bf16.msra.mxu2 %v5429_v30  ;;  %v5492_v30 = vld [vmem:[%s7236_s1 + $0x278] sm:$0xff]  ;;  %v562_v36 = vpack.c.bf16 %v490_v29, %v454_v28  ;;  %v5507_v39 = vld [vmem:[%s7236_s1 + $0x2f0] sm:$0xff]  ;;  %v5530_v28 = vld [vmem:[%s7236_s1 + $0x3a8] sm:$0xff] }
  0x38   : > { %1968 = vmatpush.bf16.msra.mxu3 %v5437_v31  ;;  %1915 = vmatmul.bf16.vlgmr.msra.gmra.mxu0 %v555_v42  ;;  %v5508_v31 = vld [vmem:[%s7236_s1 + $0x2f8] sm:$0xff]  ;;  %v5490_v42 = vld [vmem:[%s7236_s1 + $0x268] sm:$0xff]  ;;  %v5487_v62 = vld [vmem:[%s7236_s1 + $0x250] sm:$0xff] }
  0x39   : > { %1979 = vmatpush.bf16.msrb.mxu0 %v5452_v41  ;;  %1933 = vmatmul.bf16.vlgmr.msra.gmra.mxu1 %v556_v43  ;;  %v5482_v41 = vld [vmem:[%s7236_s1 + $0x228] sm:$0xff]  ;;  %v5503_v63 = vld [vmem:[%s7236_s1 + $0x2d0] sm:$0xff]  ;;  %v494_v20 = vld [vmem:[%s6080_s23 + $0x178] sm:$0xff] }
  0x3a   : > { %1951 = vmatmul.bf16.vlgmr.msra.gmra.mxu2 %v557_v44  ;;  %1997 = vmatpush.bf16.msrb.mxu1 %v5460_v46  ;;  %v5506_v43 = vld [vmem:[%s7236_s1 + $0x2e8] sm:$0xff]  ;;  %v5497_v44 = vld [vmem:[%s7236_s1 + $0x2a0] sm:$0xff]  ;;  %v5515_v26 = vld [vmem:[%s7236_s1 + $0x330] sm:$0xff] }
  0x3b   : > { %2015 = vmatpush.bf16.msrb.mxu2 %v5468_v40  ;;  %1969 = vmatmul.bf16.vlgmr.msra.gmra.mxu3 %v558_v45  ;;  %v5498_v40 = vld [vmem:[%s7236_s1 + $0x2a8] sm:$0xff]  ;;  %v5481_v45 = vld [vmem:[%s7236_s1 + $0x220] sm:$0xff]  ;;  %v5539_v27 = vld [vmem:[%s7236_s1 + $0x3f0] sm:$0xff] }
  0x3c   : > { %2033 = vmatpush.bf16.msrb.mxu3 %v5476_v47  ;;  %v5489_v46 = vld [vmem:[%s7236_s1 + $0x260] sm:$0xff]  ;;  %v5522_v29 = vld [vmem:[%s7236_s1 + $0x368] sm:$0xff] }
  0x3d   : > { %1980 = vmatpush.bf16.msrb.mxu0 %v5451_v49  ;;  %v5505_v47 = vld [vmem:[%s7236_s1 + $0x2e0] sm:$0xff] }
  0x3e   : > { %1998 = vmatpush.bf16.msrb.mxu1 %v5459_v50  ;;  %v523_v49 = vld [vmem:[%s6080_s23 + $0x260] sm:$0xff]  ;;  %v524_v50 = vld [vmem:[%s6080_s23 + $0x268] sm:$0xff] }
  0x3f   : > { %2016 = vmatpush.bf16.msrb.mxu2 %v5467_v48  ;;  %v5496_v48 = vld [vmem:[%s7236_s1 + $0x298] sm:$0xff] }
  0x40   : > { %2034 = vmatpush.bf16.msrb.mxu3 %v5475_v51  ;;  %v525_v51 = vld [vmem:[%s6080_s23 + $0x270] sm:$0xff] }
  0x41   : > { %1981 = vmatpush.bf16.msrb.mxu0 %v5450_v53  ;;  %v526_v53 = vld [vmem:[%s6080_s23 + $0x278] sm:$0xff]  ;;  %v581_v59 = vpack.c.bf16 %v525_v51, %v525_v51  ;;  %v5535_v51 = vld [vmem:[%s7236_s1 + $0x3d0] sm:$0xff] }
  0x42   : > { %1999 = vmatpush.bf16.msrb.mxu1 %v5458_v54  ;;  %v5488_v54 = vld [vmem:[%s7236_s1 + $0x258] sm:$0xff]  ;;  %v582_v60 = vpack.c.bf16 %v526_v53, %v526_v53  ;;  %v5518_v53 = vld [vmem:[%s7236_s1 + $0x348] sm:$0xff] }
  0x43   : > { %2017 = vmatpush.bf16.msrb.mxu2 %v5466_v52  ;;  %v5480_v52 = vld [vmem:[%s7236_s1 + $0x218] sm:$0xff] }
  0x44   : > { %2035 = vmatpush.bf16.msrb.mxu3 %v5474_v55  ;;  %v5504_v55 = vld [vmem:[%s7236_s1 + $0x2d8] sm:$0xff] }
  0x45   : > { %1982 = vmatpush.bf16.msrb.mxu0 %v5449_v57  ;;  %v5495_v57 = vld [vmem:[%s7236_s1 + $0x290] sm:$0xff] }
  0x46   : > { %2000 = vmatpush.bf16.msrb.mxu1 %v5457_v58  ;;  %v580_v58 = vpack.c.bf16 %v524_v50, %v524_v50  ;;  %v5511_v50 = vld [vmem:[%s7236_s1 + $0x310] sm:$0xff] }
  0x47   : > { %2018 = vmatpush.bf16.msrb.mxu2 %v5465_v56  ;;  %v579_v56 = vpack.c.bf16 %v523_v49, %v523_v49 }
  0x48   : > { %2036 = vmatpush.bf16.msrb.mxu3 %v5473_v61  ;;  %1920 = vmatmul.bf16.gmra.mxu0 %v575_v2  ;;  %v5479_v61 = vld [vmem:[%s7236_s1 + $0x210] sm:$0xff]  ;;  %v5486_v2 = vld [vmem:[%s7236_s1 + $0x248] sm:$0xff] }
  0x49   : > { %1983 = vmatpush.bf16.msrb.mxu0 %v5448_v1  ;;  %1938 = vmatmul.bf16.gmra.mxu1 %v576_v3  ;;  %v5478_v1 = vld [vmem:[%s7236_s1 + $0x208] sm:$0xff] }
  0x4a   : > { %1956 = vmatmul.bf16.gmra.mxu2 %v577_v4  ;;  %2001 = vmatpush.bf16.msrb.mxu1 %v5456_v6  ;;  %v5502_v3 = vld [vmem:[%s7236_s1 + $0x2c8] sm:$0xff]  ;;  %v5493_v4 = vld [vmem:[%s7236_s1 + $0x280] sm:$0xff] }
  0x4b   : > { %2019 = vmatpush.bf16.msrb.mxu2 %v5464_v0  ;;  %1974 = vmatmul.bf16.gmra.mxu3 %v578_v5  ;;  %v5494_v0 = vld [vmem:[%s7236_s1 + $0x288] sm:$0xff]  ;;  %v5532_v5 = vld [vmem:[%s7236_s1 + $0x3b8] sm:$0xff]  ;;  %v5477_v6 = vld [vmem:[%s7236_s1 + $0x200] sm:$0xff] }
  0x4c   : > { %2037 = vmatpush.bf16.msrb.mxu3 %v5472_v7  ;;  %v5485_v7 = vld [vmem:[%s7236_s1 + $0x240] sm:$0xff] }
  0x4d   : > { %1984 = vmatpush.bf16.msrb.mxu0 %v5447_v9  ;;  %v455_v9 = vld [vmem:[%s6080_s23 + $0x40] sm:$0xff] }
  0x4e   : > { %2002 = vmatpush.bf16.msrb.mxu1 %v5455_v10  ;;  %v491_v10 = vld [vmem:[%s6080_s23 + $0x160] sm:$0xff] }
  0x4f   : > { %2020 = vmatpush.bf16.msrb.mxu2 %v5463_v8  ;;  %v5501_v8 = vld [vmem:[%s7236_s1 + $0x2c0] sm:$0xff] }
  0x50   : > { %2038 = vmatpush.bf16.msrb.mxu3 %v5471_v11  ;;  %v5516_v11 = vld [vmem:[%s7236_s1 + $0x338] sm:$0xff] }
  0x51   : > { %1985 = vmatpush.bf16.msrb.mxu0 %v5446_v13  ;;  %v456_v13 = vld [vmem:[%s6080_s23 + $0x48] sm:$0xff] }
  0x52   : > { %2003 = vmatpush.bf16.msrb.mxu1 %v5454_v14  ;;  %v5540_v14 = vld [vmem:[%s7236_s1 + $0x3f8] sm:$0xff] }
  0x53   : > { %2021 = vmatpush.bf16.msrb.mxu2 %v5462_v12  ;;  %v5524_v12 = vld [vmem:[%s7236_s1 + $0x378] sm:$0xff] }
  0x54   : > { %2039 = vmatpush.bf16.msrb.mxu3 %v5470_v15  ;;  %v5531_v15 = vld [vmem:[%s7236_s1 + $0x3b0] sm:$0xff] }
  0x55   : > { %1986 = vmatpush.bf16.msrb.mxu0 %v5445_v17  ;;  %v457_v17 = vld [vmem:[%s6080_s23 + $0x50] sm:$0xff] }
  0x56   : > { %2004 = vmatpush.bf16.msrb.mxu1 %v5453_v18  ;;  %v493_v18 = vld [vmem:[%s6080_s23 + $0x170] sm:$0xff] }
  0x57   : > { %2022 = vmatpush.bf16.msrb.mxu2 %v5461_v16  ;;  %v492_v16 = vld [vmem:[%s6080_s23 + $0x168] sm:$0xff]  ;;  %v565_v24 = vpack.c.bf16 %v493_v18, %v457_v17 }
  0x58   : > { %2040 = vmatpush.bf16.msrb.mxu3 %v5469_v19  ;;  %1987 = vmatmul.bf16.vlgmr.msrb.gmra.mxu0 %v559_v32  ;;  %v458_v19 = vld [vmem:[%s6080_s23 + $0x58] sm:$0xff]  ;;  %v564_v23 = vpack.c.bf16 %v492_v16, %v456_v13  ;;  %v5529_v32 = vld [vmem:[%s7236_s1 + $0x3a0] sm:$0xff]  ;;  %v5562_v16 = vld [vmem:[%s7236_s1 + $0x4a8] sm:$0xff] }
  0x59   : > { %2051 = vmatpush.bf16.msra.mxu0 %v5484_v22  ;;  %2005 = vmatmul.bf16.vlgmr.msrb.gmra.mxu1 %v560_v34  ;;  %v5523_v22 = vld [vmem:[%s7236_s1 + $0x370] sm:$0xff]  ;;  %v566_v25 = vpack.c.bf16 %v494_v20, %v458_v19  ;;  %v5513_v34 = vld [vmem:[%s7236_s1 + $0x320] sm:$0xff]  ;;  %v5546_v17 = vld [vmem:[%s7236_s1 + $0x428] sm:$0xff] }
  0x5a   : > { %2069 = vmatpush.bf16.msra.mxu1 %v5492_v30  ;;  %2023 = vmatmul.bf16.vlgmr.msrb.gmra.mxu2 %v561_v35  ;;  %v5514_v30 = vld [vmem:[%s7236_s1 + $0x328] sm:$0xff]  ;;  %v5537_v35 = vld [vmem:[%s7236_s1 + $0x3e0] sm:$0xff] }
  0x5b   : > { %2087 = vmatpush.bf16.msra.mxu2 %v5500_v21  ;;  %2041 = vmatmul.bf16.vlgmr.msrb.gmra.mxu3 %v562_v36  ;;  %v563_v21 = vpack.c.bf16 %v491_v10, %v455_v9  ;;  %v5528_v36 = vld [vmem:[%s7236_s1 + $0x398] sm:$0xff]  ;;  %v5547_v10 = vld [vmem:[%s7236_s1 + $0x430] sm:$0xff]  ;;  %v5554_v18 = vld [vmem:[%s7236_s1 + $0x468] sm:$0xff] }
  0x5c   : > { %2105 = vmatpush.bf16.msra.mxu3 %v5508_v31  ;;  %v5538_v31 = vld [vmem:[%s7236_s1 + $0x3e8] sm:$0xff]  ;;  %v498_v9 = vld [vmem:[%s6080_s23 + $0x198] sm:$0xff]  ;;  %v5561_v20 = vld [vmem:[%s7236_s1 + $0x4a0] sm:$0xff] }
  0x5d   : > { %2052 = vmatpush.bf16.msra.mxu0 %v5483_v37  ;;  %v5520_v37 = vld [vmem:[%s7236_s1 + $0x358] sm:$0xff]  ;;  %v5570_v19 = vld [vmem:[%s7236_s1 + $0x4e8] sm:$0xff] }
  0x5e   : > { %2070 = vmatpush.bf16.msra.mxu1 %v5491_v38  ;;  %v527_v38 = vld [vmem:[%s6080_s23 + $0x280] sm:$0xff] }
  0x5f   : > { %2088 = vmatpush.bf16.msra.mxu2 %v5499_v33  ;;  %v5521_v33 = vld [vmem:[%s7236_s1 + $0x360] sm:$0xff] }
  0x60   : > { %2106 = vmatpush.bf16.msra.mxu3 %v5507_v39  ;;  %v528_v39 = vld [vmem:[%s6080_s23 + $0x288] sm:$0xff] }
  0x61   : > { %2053 = vmatpush.bf16.msra.mxu0 %v5482_v41  ;;  %v5512_v41 = vld [vmem:[%s7236_s1 + $0x318] sm:$0xff] }
  0x62   : > { %2071 = vmatpush.bf16.msra.mxu1 %v5490_v42  ;;  %v530_v42 = vld [vmem:[%s6080_s23 + $0x298] sm:$0xff] }
  0x63   : > { %2089 = vmatpush.bf16.msra.mxu2 %v5498_v40  ;;  %v529_v40 = vld [vmem:[%s6080_s23 + $0x290] sm:$0xff]  ;;  %v586_v49 = vpack.c.bf16 %v530_v42, %v530_v42  ;;  %v5550_v42 = vld [vmem:[%s7236_s1 + $0x448] sm:$0xff] }
  0x64   : > { %2107 = vmatpush.bf16.msra.mxu3 %v5506_v43  ;;  %v5536_v43 = vld [vmem:[%s7236_s1 + $0x3d8] sm:$0xff] }
  0x65   : > { %2054 = vmatpush.bf16.msra.mxu0 %v5481_v45  ;;  %v583_v45 = vpack.c.bf16 %v527_v38, %v527_v38 }
  0x66   : > { %2072 = vmatpush.bf16.msra.mxu1 %v5489_v46  ;;  %v5519_v46 = vld [vmem:[%s7236_s1 + $0x350] sm:$0xff] }
  0x67   : > { %2090 = vmatpush.bf16.msra.mxu2 %v5497_v44  ;;  %v5527_v44 = vld [vmem:[%s7236_s1 + $0x390] sm:$0xff] }
  0x68   : > { %2108 = vmatpush.bf16.msra.mxu3 %v5505_v47  ;;  %1992 = vmatmul.bf16.gmra.mxu0 %v579_v56  ;;  %v584_v47 = vpack.c.bf16 %v528_v39, %v528_v39  ;;  %v5525_v56 = vld [vmem:[%s7236_s1 + $0x380] sm:$0xff] }
  0x69   : > { %2055 = vmatpush.bf16.msra.mxu0 %v5480_v52  ;;  %2010 = vmatmul.bf16.gmra.mxu1 %v580_v58  ;;  %v5526_v52 = vld [vmem:[%s7236_s1 + $0x388] sm:$0xff]  ;;  %v5564_v58 = vld [vmem:[%s7236_s1 + $0x4b8] sm:$0xff] }
  0x6a   : > { %2073 = vmatpush.bf16.msra.mxu1 %v5488_v54  ;;  %2028 = vmatmul.bf16.gmra.mxu2 %v581_v59  ;;  %v5510_v54 = vld [vmem:[%s7236_s1 + $0x308] sm:$0xff]  ;;  %v5556_v59 = vld [vmem:[%s7236_s1 + $0x478] sm:$0xff] }
  0x6b   : > { %2091 = vmatpush.bf16.msra.mxu2 %v5496_v48  ;;  %2046 = vmatmul.bf16.gmra.mxu3 %v582_v60  ;;  %v585_v48 = vpack.c.bf16 %v529_v40, %v529_v40  ;;  %v5509_v60 = vld [vmem:[%s7236_s1 + $0x300] sm:$0xff]  ;;  %v5558_v40 = vld [vmem:[%s7236_s1 + $0x488] sm:$0xff] }
  0x6c   : > { %2109 = vmatpush.bf16.msra.mxu3 %v5504_v55  ;;  %v5534_v55 = vld [vmem:[%s7236_s1 + $0x3c8] sm:$0xff] }
  0x6d   : > { %2056 = vmatpush.bf16.msra.mxu0 %v5479_v61  ;;  %v5533_v61 = vld [vmem:[%s7236_s1 + $0x3c0] sm:$0xff] }
  0x6e   : > { %2074 = vmatpush.bf16.msra.mxu1 %v5487_v62  ;;  %v5548_v62 = vld [vmem:[%s7236_s1 + $0x438] sm:$0xff] }
  0x6f   : > { %2092 = vmatpush.bf16.msra.mxu2 %v5495_v57  ;;  %v5517_v57 = vld [vmem:[%s7236_s1 + $0x340] sm:$0xff] }
  0x70   : > { %2110 = vmatpush.bf16.msra.mxu3 %v5503_v63  ;;  %v459_v63 = vld [vmem:[%s6080_s23 + $0x60] sm:$0xff] }
  0x71   : > { %2057 = vmatpush.bf16.msra.mxu0 %v5478_v1  ;;  %v5563_v1 = vld [vmem:[%s7236_s1 + $0x4b0] sm:$0xff] }
  0x72   : > { %2075 = vmatpush.bf16.msra.mxu1 %v5486_v2  ;;  %v495_v2 = vld [vmem:[%s6080_s23 + $0x180] sm:$0xff] }
  0x73   : > { %2093 = vmatpush.bf16.msra.mxu2 %v5494_v0  ;;  %v5572_v0 = vld [vmem:[%s7236_s1 + $0x4f8] sm:$0xff] }
  0x74   : > { %2111 = vmatpush.bf16.msra.mxu3 %v5502_v3  ;;  %v460_v3 = vld [vmem:[%s6080_s23 + $0x68] sm:$0xff] }
  0x75   : > { %2058 = vmatpush.bf16.msra.mxu0 %v5477_v6  ;;  %v461_v6 = vld [vmem:[%s6080_s23 + $0x70] sm:$0xff] }
  0x76   : > { %2076 = vmatpush.bf16.msra.mxu1 %v5485_v7  ;;  %v497_v7 = vld [vmem:[%s6080_s23 + $0x190] sm:$0xff] }
  0x77   : > { %2094 = vmatpush.bf16.msra.mxu2 %v5493_v4  ;;  %v5555_v4 = vld [vmem:[%s7236_s1 + $0x470] sm:$0xff] }
  0x78   : > { %2112 = vmatpush.bf16.msra.mxu3 %v5501_v8  ;;  %2059 = vmatmul.bf16.vlgmr.msra.gmra.mxu0 %v563_v21  ;;  %v462_v8 = vld [vmem:[%s6080_s23 + $0x78] sm:$0xff]  ;;  %v5545_v21 = vld [vmem:[%s7236_s1 + $0x420] sm:$0xff] }
  0x79   : > { %2123 = vmatpush.bf16.msrb.mxu0 %v5516_v11  ;;  %2077 = vmatmul.bf16.vlgmr.msra.gmra.mxu1 %v564_v23  ;;  %v567_v11 = vpack.c.bf16 %v495_v2, %v459_v63  ;;  %v5569_v23 = vld [vmem:[%s7236_s1 + $0x4e0] sm:$0xff]  ;;  %v502_v63 = vld [vmem:[%s6080_s23 + $0x1b8] sm:$0xff] }
  0x7a   : > { %2141 = vmatpush.bf16.msrb.mxu1 %v5524_v12  ;;  %2095 = vmatmul.bf16.vlgmr.msra.gmra.mxu2 %v565_v24  ;;  %v5571_v12 = vld [vmem:[%s7236_s1 + $0x4f0] sm:$0xff]  ;;  %v5560_v24 = vld [vmem:[%s7236_s1 + $0x498] sm:$0xff] }
  0x7b   : > { %2159 = vmatpush.bf16.msrb.mxu2 %v5532_v5  ;;  %2113 = vmatmul.bf16.vlgmr.msra.gmra.mxu3 %v566_v25  ;;  %v496_v5 = vld [vmem:[%s6080_s23 + $0x188] sm:$0xff]  ;;  %v5544_v25 = vld [vmem:[%s7236_s1 + $0x418] sm:$0xff] }
  0x7c   : > { %2177 = vmatpush.bf16.msrb.mxu3 %v5540_v14  ;;  %v568_v13 = vpack.c.bf16 %v496_v5, %v460_v3  ;;  %v569_v14 = vpack.c.bf16 %v497_v7, %v461_v6 }
  0x7d   : > { %2124 = vmatpush.bf16.msrb.mxu0 %v5515_v26  ;;  %v5552_v26 = vld [vmem:[%s7236_s1 + $0x458] sm:$0xff] }
  0x7e   : > { %2142 = vmatpush.bf16.msrb.mxu1 %v5523_v22  ;;  %v5553_v22 = vld [vmem:[%s7236_s1 + $0x460] sm:$0xff] }
  0x7f   : > { %2160 = vmatpush.bf16.msrb.mxu2 %v5531_v15  ;;  %v570_v15 = vpack.c.bf16 %v498_v9, %v462_v8  ;;  %v5578_v8 = vld [vmem:[%s7237_s2 + $0x28] sm:$0xff] }
  0x80   : > { %2178 = vmatpush.bf16.msrb.mxu3 %v5539_v27  ;;  %v5568_v27 = vld [vmem:[%s7236_s1 + $0x4d8] sm:$0xff]  ;;  %v5586_v9 = vld [vmem:[%s7237_s2 + $0x68] sm:$0xff] }
  0x81   : > { %2125 = vmatpush.bf16.msrb.mxu0 %v5514_v30  ;;  %v533_v30 = vld [vmem:[%s6080_s23 + $0x2b0] sm:$0xff] }
  0x82   : > { %2143 = vmatpush.bf16.msrb.mxu1 %v5522_v29  ;;  %v532_v29 = vld [vmem:[%s6080_s23 + $0x2a8] sm:$0xff]  ;;  %v589_v38 = vpack.c.bf16 %v533_v30, %v533_v30  ;;  %v5575_v30 = vld [vmem:[%s7237_s2 + $0x10] sm:$0xff] }
  0x83   : > { %2161 = vmatpush.bf16.msrb.mxu2 %v5530_v28  ;;  %v531_v28 = vld [vmem:[%s6080_s23 + $0x2a0] sm:$0xff] }
  0x84   : > { %2179 = vmatpush.bf16.msrb.mxu3 %v5538_v31  ;;  %v5559_v31 = vld [vmem:[%s7236_s1 + $0x490] sm:$0xff] }
  0x85   : > { %2126 = vmatpush.bf16.msrb.mxu0 %v5513_v34  ;;  %v5551_v34 = vld [vmem:[%s7236_s1 + $0x450] sm:$0xff] }
  0x86   : > { %2144 = vmatpush.bf16.msrb.mxu1 %v5521_v33  ;;  %v5543_v33 = vld [vmem:[%s7236_s1 + $0x410] sm:$0xff] }
  0x87   : > { %2162 = vmatpush.bf16.msrb.mxu2 %v5529_v32  ;;  %v534_v32 = vld [vmem:[%s6080_s23 + $0x2b8] sm:$0xff] }
  0x88   : > { %2180 = vmatpush.bf16.msrb.mxu3 %v5537_v35  ;;  %2064 = vmatmul.bf16.gmra.mxu0 %v583_v45  ;;  %v587_v35 = vpack.c.bf16 %v531_v28, %v531_v28  ;;  %v590_v39 = vpack.c.bf16 %v534_v32, %v534_v32  ;;  %v5541_v45 = vld [vmem:[%s7236_s1 + $0x400] sm:$0xff]  ;;  %v536_v28 = vld [vmem:[%s6080_s23 + $0x2c8] sm:$0xff]  ;;  %v5583_v32 = vld [vmem:[%s7237_s2 + $0x50] sm:$0xff] }
  0x89   : > { %2127 = vmatpush.bf16.msrb.mxu0 %v5512_v41  ;;  %2082 = vmatmul.bf16.gmra.mxu1 %v584_v47  ;;  %v5542_v41 = vld [vmem:[%s7236_s1 + $0x408] sm:$0xff]  ;;  %v5565_v47 = vld [vmem:[%s7236_s1 + $0x4c0] sm:$0xff] }
  0x8a   : > { %2145 = vmatpush.bf16.msrb.mxu1 %v5520_v37  ;;  %2100 = vmatmul.bf16.gmra.mxu2 %v585_v48  ;;  %v588_v37 = vpack.c.bf16 %v532_v29, %v532_v29  ;;  %v5596_v48 = vld [vmem:[%s7237_s2 + $0xb8] sm:$0xff]  ;;  %v537_v29 = vld [vmem:[%s6080_s23 + $0x2d0] sm:$0xff] }
  0x8b   : > { %2163 = vmatpush.bf16.msrb.mxu2 %v5528_v36  ;;  %2118 = vmatmul.bf16.gmra.mxu3 %v586_v49  ;;  %v5567_v36 = vld [vmem:[%s7236_s1 + $0x4d0] sm:$0xff]  ;;  %v5580_v49 = vld [vmem:[%s7237_s2 + $0x38] sm:$0xff] }
  0x8c   : > { %2181 = vmatpush.bf16.msrb.mxu3 %v5536_v43  ;;  %v5566_v43 = vld [vmem:[%s7236_s1 + $0x4c8] sm:$0xff] }
  0x8d   : > { %2128 = vmatpush.bf16.msrb.mxu0 %v5511_v50  ;;  %v5588_v50 = vld [vmem:[%s7237_s2 + $0x78] sm:$0xff] }
  0x8e   : > { %2146 = vmatpush.bf16.msrb.mxu1 %v5519_v46  ;;  %v5549_v46 = vld [vmem:[%s7236_s1 + $0x440] sm:$0xff] }
  0x8f   : > { %2164 = vmatpush.bf16.msrb.mxu2 %v5527_v44  ;;  %v5557_v44 = vld [vmem:[%s7236_s1 + $0x480] sm:$0xff] }
  0x90   : > { %2182 = vmatpush.bf16.msrb.mxu3 %v5535_v51  ;;  %v5604_v51 = vld [vmem:[%s7237_s2 + $0xf8] sm:$0xff] }
  0x91   : > { %2129 = vmatpush.bf16.msrb.mxu0 %v5510_v54  ;;  %v464_v54 = vld [vmem:[%s6080_s23 + $0x88] sm:$0xff] }
  0x92   : > { %2147 = vmatpush.bf16.msrb.mxu1 %v5518_v53  ;;  %v499_v53 = vld [vmem:[%s6080_s23 + $0x1a0] sm:$0xff] }
  0x93   : > { %2165 = vmatpush.bf16.msrb.mxu2 %v5526_v52  ;;  %v463_v52 = vld [vmem:[%s6080_s23 + $0x80] sm:$0xff] }
  0x94   : > { %2183 = vmatpush.bf16.msrb.mxu3 %v5534_v55  ;;  %v5595_v55 = vld [vmem:[%s7237_s2 + $0xb0] sm:$0xff] }
  0x95   : > { %2130 = vmatpush.bf16.msrb.mxu0 %v5509_v60  ;;  %v501_v60 = vld [vmem:[%s6080_s23 + $0x1b0] sm:$0xff] }
  0x96   : > { %2148 = vmatpush.bf16.msrb.mxu1 %v5517_v57  ;;  %v5579_v57 = vld [vmem:[%s7237_s2 + $0x30] sm:$0xff] }
  0x97   : > { %2166 = vmatpush.bf16.msrb.mxu2 %v5525_v56  ;;  %v500_v56 = vld [vmem:[%s6080_s23 + $0x1a8] sm:$0xff] }
  0x98   : > { %2184 = vmatpush.bf16.msrb.mxu3 %v5533_v61  ;;  %2131 = vmatmul.bf16.vlgmr.msrb.gmra.mxu0 %v567_v11  ;;  %v5603_v61 = vld [vmem:[%s7237_s2 + $0xf0] sm:$0xff]  ;;  %v5593_v11 = vld [vmem:[%s7237_s2 + $0xa0] sm:$0xff] }
  0x99   : > { %2195 = vmatpush.bf16.msra.mxu0 %v5548_v62  ;;  %2149 = vmatmul.bf16.vlgmr.msrb.gmra.mxu1 %v568_v13  ;;  %v466_v62 = vld [vmem:[%s6080_s23 + $0x98] sm:$0xff]  ;;  %v5585_v13 = vld [vmem:[%s7237_s2 + $0x60] sm:$0xff] }
  0x9a   : > { %2213 = vmatpush.bf16.msra.mxu1 %v5556_v59  ;;  %2167 = vmatmul.bf16.vlgmr.msrb.gmra.mxu2 %v569_v14  ;;  %v465_v59 = vld [vmem:[%s6080_s23 + $0x90] sm:$0xff]  ;;  %v574_v7 = vpack.c.bf16 %v502_v63, %v466_v62  ;;  %v5601_v14 = vld [vmem:[%s7237_s2 + $0xe0] sm:$0xff] }
  0x9b   : > { %2231 = vmatpush.bf16.msra.mxu2 %v5564_v58  ;;  %2185 = vmatmul.bf16.vlgmr.msrb.gmra.mxu3 %v570_v15  ;;  %v5587_v58 = vld [vmem:[%s7237_s2 + $0x70] sm:$0xff]  ;;  %v573_v5 = vpack.c.bf16 %v501_v60, %v465_v59 }
  0x9c   : > { %2249 = vmatpush.bf16.msra.mxu3 %v5572_v0  ;;  %v571_v0 = vpack.c.bf16 %v499_v53, %v463_v52  ;;  %v5581_v52 = vld [vmem:[%s7237_s2 + $0x40] sm:$0xff]  ;;  %v5627_v62 = vld [vmem:[%s7237_s2 + $0x1b0] sm:$0xff] }
  0x9d   : > { %2196 = vmatpush.bf16.msra.mxu0 %v5547_v10  ;;  %v5602_v10 = vld [vmem:[%s7237_s2 + $0xe8] sm:$0xff]  ;;  %v5597_v53 = vld [vmem:[%s7237_s2 + $0xc0] sm:$0xff] }
  0x9e   : > { %2214 = vmatpush.bf16.msra.mxu1 %v5555_v4  ;;  %v572_v4 = vpack.c.bf16 %v500_v56, %v464_v54  ;;  %v5612_v56 = vld [vmem:[%s7237_s2 + $0x138] sm:$0xff] }
  0x9f   : > { %2232 = vmatpush.bf16.msra.mxu2 %v5563_v1  ;;  %v5594_v1 = vld [vmem:[%s7237_s2 + $0xa8] sm:$0xff] }
  0xa0   : > { %2250 = vmatpush.bf16.msra.mxu3 %v5571_v12  ;;  %v5577_v12 = vld [vmem:[%s7237_s2 + $0x20] sm:$0xff] }
  0xa1   : > { %2197 = vmatpush.bf16.msra.mxu0 %v5546_v17  ;;  %v5592_v17 = vld [vmem:[%s7237_s2 + $0x98] sm:$0xff] }
  0xa2   : > { %2215 = vmatpush.bf16.msra.mxu1 %v5554_v18 }
  0xa3   : > { %2233 = vmatpush.bf16.msra.mxu2 %v5562_v16 }
  0xa4   : > { %2251 = vmatpush.bf16.msra.mxu3 %v5570_v19 }
  0xa5   : > { %2198 = vmatpush.bf16.msra.mxu0 %v5545_v21 }
  0xa6   : > { %2216 = vmatpush.bf16.msra.mxu1 %v5553_v22  ;;  %v5576_v22 = vld [vmem:[%s7237_s2 + $0x18] sm:$0xff] }
  0xa7   : > { %2234 = vmatpush.bf16.msra.mxu2 %v5561_v20 }
  0xa8   : > { %2252 = vmatpush.bf16.msra.mxu3 %v5569_v23  ;;  %2136 = vmatmul.bf16.gmra.mxu0 %v587_v35 }
  0xa9   : > { %2199 = vmatpush.bf16.msra.mxu0 %v5544_v25  ;;  %2154 = vmatmul.bf16.gmra.mxu1 %v588_v37  ;;  %v5600_v25 = vld [vmem:[%s7237_s2 + $0xd8] sm:$0xff]  ;;  %v5590_v37 = vld [vmem:[%s7237_s2 + $0x88] sm:$0xff] }
  0xaa   : > { %2217 = vmatpush.bf16.msra.mxu1 %v5552_v26  ;;  %2172 = vmatmul.bf16.gmra.mxu2 %v589_v38  ;;  %v5591_v26 = vld [vmem:[%s7237_s2 + $0x90] sm:$0xff] }
  0xab   : > { %2235 = vmatpush.bf16.msra.mxu2 %v5560_v24  ;;  %2190 = vmatmul.bf16.gmra.mxu3 %v590_v39  ;;  %v5584_v24 = vld [vmem:[%s7237_s2 + $0x58] sm:$0xff] }
  0xac   : > { %2253 = vmatpush.bf16.msra.mxu3 %v5568_v27  ;;  %v535_v27 = vld [vmem:[%s6080_s23 + $0x2c0] sm:$0xff] }
  0xad   : > { %2200 = vmatpush.bf16.msra.mxu0 %v5543_v33  ;;  %v5599_v33 = vld [vmem:[%s7237_s2 + $0xd0] sm:$0xff] }
  0xae   : > { %2218 = vmatpush.bf16.msra.mxu1 %v5551_v34 }
  0xaf   : > { %2236 = vmatpush.bf16.msra.mxu2 %v5559_v31  ;;  %v538_v31 = vld [vmem:[%s6080_s23 + $0x2d8] sm:$0xff] }
  0xb0   : > { %2254 = vmatpush.bf16.msra.mxu3 %v5567_v36  ;;  %v591_v36 = vpack.c.bf16 %v535_v27, %v535_v27  ;;  %v5609_v27 = vld [vmem:[%s7237_s2 + $0x120] sm:$0xff] }
  0xb1   : > { %2201 = vmatpush.bf16.msra.mxu0 %v5542_v41  ;;  %v592_v41 = vpack.c.bf16 %v536_v28, %v536_v28  ;;  %v5633_v28 = vld [vmem:[%s7237_s2 + $0x1e0] sm:$0xff] }
  0xb2   : > { %2219 = vmatpush.bf16.msra.mxu1 %v5550_v42  ;;  %v593_v42 = vpack.c.bf16 %v537_v29, %v537_v29  ;;  %v5624_v29 = vld [vmem:[%s7237_s2 + $0x198] sm:$0xff] }
  0xb3   : > { %2237 = vmatpush.bf16.msra.mxu2 %v5558_v40 }
  0xb4   : > { %2255 = vmatpush.bf16.msra.mxu3 %v5566_v43 }
  0xb5   : > { %2202 = vmatpush.bf16.msra.mxu0 %v5541_v45  ;;  %v1916_v2 = vpop.f32.mrf.mxu0  ;;  %v5574_v45 = vld [vmem:[%s7237_s2 + $0x8] sm:$0xff] }
  0xb6   : > { %2220 = vmatpush.bf16.msra.mxu1 %v5549_v46  ;;  %v1934_v3 = vpop.f32.mrf.mxu1 }
  0xb7   : > { %2238 = vmatpush.bf16.msra.mxu2 %v5557_v44  ;;  %v1935_v6 = vadd.f32 %v1934_v3, %v1916_v2  ;;  %v594_v44 = vpack.c.bf16 %v538_v31, %v538_v31  ;;  %v5611_v2 = vld [vmem:[%s7237_s2 + $0x130] sm:$0xff]  ;;  %v5616_v31 = vld [vmem:[%s7237_s2 + $0x158] sm:$0xff] }
  0xb8   : > { %2256 = vmatpush.bf16.msra.mxu3 %v5565_v47  ;;  %2203 = vmatmul.bf16.vlgmr.msra.gmra.mxu0 %v571_v0  ;;  %v5582_v47 = vld [vmem:[%s7237_s2 + $0x48] sm:$0xff]  ;;  %v467_v0 = vld [vmem:[%s6080_s23 + $0xa0] sm:$0xff]  ;;  %v5619_v3 = vld [vmem:[%s7237_s2 + $0x170] sm:$0xff] }
  0xb9   : > { %3291 = vmatpush.bf16.msrb.mxu0 %v5580_v49  ;;  %2221 = vmatmul.bf16.vlgmr.msra.gmra.mxu1 %v572_v4  ;;  %v5589_v49 = vld [vmem:[%s7237_s2 + $0x80] sm:$0xff]  ;;  %v468_v4 = vld [vmem:[%s6080_s23 + $0xa8] sm:$0xff] }
  0xba   : > { %3309 = vmatpush.bf16.msrb.mxu1 %v5588_v50  ;;  %2239 = vmatmul.bf16.vlgmr.msra.gmra.mxu2 %v573_v5  ;;  %v5628_v50 = vld [vmem:[%s7237_s2 + $0x1b8] sm:$0xff]  ;;  %v5635_v5 = vld [vmem:[%s7237_s2 + $0x1f0] sm:$0xff] }
  0xbb   : > { %3327 = vmatpush.bf16.msrb.mxu2 %v5596_v48  ;;  %2257 = vmatmul.bf16.vlgmr.msra.gmra.mxu3 %v574_v7  ;;  %v5598_v48 = vld [vmem:[%s7237_s2 + $0xc8] sm:$0xff] }
  0xbc   : > { %3345 = vmatpush.bf16.msrb.mxu3 %v5604_v51  ;;  %v5573_v51 = vld [vmem:[%s7237_s2] sm:$0xff]  ;;  %v504_v7 = vld [vmem:[%s6080_s23 + $0x1c8] sm:$0xff] }
  0xbd   : > { %3292 = vmatpush.bf16.msrb.mxu0 %v5579_v57  ;;  %v1952_v15 = vpop.f32.mrf.mxu2  ;;  %v1918_v19 = vpop.f32.mrf.mxu0  ;;  %v5620_v57 = vld [vmem:[%s7237_s2 + $0x178] sm:$0xff] }
  0xbe   : > { %3310 = vmatpush.bf16.msrb.mxu1 %v5587_v58  ;;  %v1970_v16 = vpop.f32.mrf.mxu3  ;;  %v1953_v18 = vadd.f32 %v1952_v15, %v1935_v6  ;;  %v1936_v20 = vpop.f32.mrf.mxu1  ;;  %v5626_v6 = vld [vmem:[%s7237_s2 + $0x1a8] sm:$0xff] }
  0xbf   : > { %3328 = vmatpush.bf16.msrb.mxu2 %v5595_v55  ;;  %v1937_v21 = vadd.f32 %v1936_v20, %v1918_v19  ;;  %v5618_v15 = vld [vmem:[%s7237_s2 + $0x168] sm:$0xff] }
  0xc0   : > { %3346 = vmatpush.bf16.msrb.mxu3 %v5603_v61  ;;  %v6591_v23 = vadd.f32 %v1970_v16, %v1953_v18  ;;  %v5636_v61 = vld [vmem:[%s7237_s2 + $0x1f8] sm:$0xff] }
  0xc1   : > { %3293 = vmatpush.bf16.msrb.mxu0 %v5578_v8  ;;  %v469_v8 = vld [vmem:[%s6080_s23 + $0xb0] sm:$0xff] }
  0xc2   : > { %3311 = vmatpush.bf16.msrb.mxu1 %v5586_v9  ;;  %v505_v9 = vld [vmem:[%s6080_s23 + $0x1d0] sm:$0xff] }
  0xc3   : > { %3329 = vmatpush.bf16.msrb.mxu2 %v5594_v1  ;;  %v503_v1 = vld [vmem:[%s6080_s23 + $0x1c0] sm:$0xff]  ;;  %v597_v18 = vpack.c.bf16 %v505_v9, %v469_v8  ;;  %v5668_v9 = vld [vmem:[%s7237_s2 + $0x2f8] sm:$0xff] }
  0xc4   : > { %3347 = vmatpush.bf16.msrb.mxu3 %v5602_v10  ;;  %v470_v10 = vld [vmem:[%s6080_s23 + $0xb8] sm:$0xff] }
  0xc5   : > { %3294 = vmatpush.bf16.msrb.mxu0 %v5577_v12  ;;  %v1954_v34 = vpop.f32.mrf.mxu2  ;;  %v1921_v39 = vpop.f32.mrf.mxu0 }
  0xc6   : > { %3312 = vmatpush.bf16.msrb.mxu1 %v5585_v13  ;;  %v1972_v35 = vpop.f32.mrf.mxu3  ;;  %v1955_v38 = vadd.f32 %v1954_v34, %v1937_v21  ;;  %v1939_v40 = vpop.f32.mrf.mxu1 }
  0xc7   : > { %3330 = vmatpush.bf16.msrb.mxu2 %v5593_v11  ;;  %v1940_v43 = vadd.f32 %v1939_v40, %v1921_v39  ;;  %v506_v11 = vld [vmem:[%s6080_s23 + $0x1d8] sm:$0xff]  ;;  %v5623_v40 = vld [vmem:[%s7237_s2 + $0x190] sm:$0xff] }
  0xc8   : > { %3348 = vmatpush.bf16.msrb.mxu3 %v5601_v14  ;;  %v6621_v46 = vadd.f32 %v1972_v35, %v1955_v38  ;;  %2208 = vmatmul.bf16.gmra.mxu0 %v591_v36  ;;  %v595_v14 = vpack.c.bf16 %v503_v1, %v467_v0  ;;  %v598_v21 = vpack.c.bf16 %v506_v11, %v470_v10  ;;  %v5632_v39 = vld [vmem:[%s7237_s2 + $0x1d8] sm:$0xff]  ;;  %v5630_v0 = vld [vmem:[%s7237_s2 + $0x1c8] sm:$0xff]  ;;  %v5621_v1 = vld [vmem:[%s7237_s2 + $0x180] sm:$0xff] }
  0xc9   : > { %3295 = vmatpush.bf16.msrb.mxu0 %v5576_v22  ;;  %2226 = vmatmul.bf16.gmra.mxu1 %v592_v41  ;;  %v5610_v22 = vld [vmem:[%s7237_s2 + $0x128] sm:$0xff]  ;;  %v5659_v10 = vld [vmem:[%s7237_s2 + $0x2b0] sm:$0xff] }
  0xca   : > { %3313 = vmatpush.bf16.msrb.mxu1 %v5584_v24  ;;  %2244 = vmatmul.bf16.gmra.mxu2 %v593_v42  ;;  %v5634_v24 = vld [vmem:[%s7237_s2 + $0x1e8] sm:$0xff]  ;;  %v5615_v42 = vld [vmem:[%s7237_s2 + $0x150] sm:$0xff] }
  0xcb   : > { %3331 = vmatpush.bf16.msrb.mxu2 %v5592_v17  ;;  %2262 = vmatmul.bf16.gmra.mxu3 %v594_v44  ;;  %v596_v17 = vpack.c.bf16 %v504_v7, %v468_v4  ;;  %v540_v44 = vld [vmem:[%s6080_s23 + $0x2e8] sm:$0xff]  ;;  %v5652_v4 = vld [vmem:[%s7237_s2 + $0x278] sm:$0xff] }
  0xcc   : > { %3349 = vmatpush.bf16.msrb.mxu3 %v5600_v25  ;;  %v5625_v25 = vld [vmem:[%s7237_s2 + $0x1a0] sm:$0xff]  ;;  %v5644_v7 = vld [vmem:[%s7237_s2 + $0x238] sm:$0xff] }
  0xcd   : > { %3296 = vmatpush.bf16.msrb.mxu0 %v5575_v30  ;;  %v1957_v54 = vpop.f32.mrf.mxu2  ;;  %v1923_v59 = vpop.f32.mrf.mxu0 }
  0xce   : > { %3314 = vmatpush.bf16.msrb.mxu1 %v5583_v32  ;;  %v1975_v55 = vpop.f32.mrf.mxu3  ;;  %v1958_v58 = vadd.f32 %v1957_v54, %v1940_v43  ;;  %v1941_v60 = vpop.f32.mrf.mxu1  ;;  %v539_v43 = vld [vmem:[%s6080_s23 + $0x2e0] sm:$0xff] }
  0xcf   : > { %3332 = vmatpush.bf16.msrb.mxu2 %v5591_v26 }
  0xd0   : > { %3350 = vmatpush.bf16.msrb.mxu3 %v5599_v33  ;;  %v6656_v63 = vadd.f32 %v1975_v55, %v1958_v58 }
  0xd1   : > { %3297 = vmatpush.bf16.msrb.mxu0 %v5574_v45  ;;  %v541_v45 = vld [vmem:[%s6080_s23 + $0x2f0] sm:$0xff] }
  0xd2   : > { %3315 = vmatpush.bf16.msrb.mxu1 %v5582_v47  ;;  %v542_v47 = vld [vmem:[%s6080_s23 + $0x2f8] sm:$0xff] }
  0xd3   : > { %3333 = vmatpush.bf16.msrb.mxu2 %v5590_v37  ;;  %v5608_v37 = vld [vmem:[%s7237_s2 + $0x118] sm:$0xff]  ;;  %v614_v60 = vpack.c.bf16 %v542_v47, %v542_v47 }
  0xd4   : > { %3351 = vmatpush.bf16.msrb.mxu3 %v5598_v48  ;;  %v5631_v48 = vld [vmem:[%s7237_s2 + $0x1d0] sm:$0xff]  ;;  %v5648_v47 = vld [vmem:[%s7237_s2 + $0x258] sm:$0xff] }
  0xd5   : > { %3298 = vmatpush.bf16.msrb.mxu0 %v5573_v51  ;;  %v1959_v12 = vpop.f32.mrf.mxu2  ;;  %v1988_v16 = vpop.f32.mrf.mxu0  ;;  %v611_v51 = vpack.c.bf16 %v539_v43, %v539_v43  ;;  %v5649_v43 = vld [vmem:[%s7237_s2 + $0x260] sm:$0xff] }
  0xd6   : > { %3316 = vmatpush.bf16.msrb.mxu1 %v5581_v52  ;;  %v1977_v13 = vpop.f32.mrf.mxu3  ;;  %v1989_v19 = vadd.f32 %v1988_v16, %v6591_v23  ;;  %v2006_v20 = vpop.f32.mrf.mxu1  ;;  %v5617_v23 = vld [vmem:[%s7237_s2 + $0x160] sm:$0xff]  ;;  %v5614_v52 = vld [vmem:[%s7237_s2 + $0x148] sm:$0xff] }
  0xd7   : > { %3334 = vmatpush.bf16.msrb.mxu2 %v5589_v49  ;;  %v5622_v49 = vld [vmem:[%s7237_s2 + $0x188] sm:$0xff] }
  0xd8   : > { %3352 = vmatpush.bf16.msrb.mxu3 %v5597_v53  ;;  %v2007_v26 = vadd.f32 %v2006_v20, %v1989_v19  ;;  %3299 = vmatmul.bf16.vlgmr.msrb.gmra.mxu0 %v595_v14  ;;  %v5651_v14 = vld [vmem:[%s7237_s2 + $0x270] sm:$0xff]  ;;  %v5658_v20 = vld [vmem:[%s7237_s2 + $0x2a8] sm:$0xff] }
  0xd9   : > { %3363 = vmatpush.bf16.msra.mxu0 %v5612_v56  ;;  %3317 = vmatmul.bf16.vlgmr.msrb.gmra.mxu1 %v596_v17  ;;  %v612_v56 = vpack.c.bf16 %v540_v44, %v540_v44  ;;  %v5643_v17 = vld [vmem:[%s7237_s2 + $0x230] sm:$0xff] }
  0xda   : > { %3381 = vmatpush.bf16.msra.mxu1 %v5620_v57  ;;  %3335 = vmatmul.bf16.vlgmr.msrb.gmra.mxu2 %v597_v18  ;;  %v613_v57 = vpack.c.bf16 %v541_v45, %v541_v45  ;;  %v471_v18 = vld [vmem:[%s6080_s23 + $0xc0] sm:$0xff]  ;;  %v5667_v19 = vld [vmem:[%s7237_s2 + $0x2f0] sm:$0xff]  ;;  %v5656_v45 = vld [vmem:[%s7237_s2 + $0x298] sm:$0xff] }
  0xdb   : > { %3399 = vmatpush.bf16.msra.mxu2 %v5628_v50  ;;  %3353 = vmatmul.bf16.vlgmr.msrb.gmra.mxu3 %v598_v21  ;;  %v507_v21 = vld [vmem:[%s6080_s23 + $0x1e0] sm:$0xff] }
  0xdc   : > { %3417 = vmatpush.bf16.msra.mxu3 %v5636_v61  ;;  %v5606_v61 = vld [vmem:[%s7237_s2 + $0x108] sm:$0xff] }
  0xdd   : > { %3364 = vmatpush.bf16.msra.mxu0 %v5611_v2  ;;  %v2024_v30 = vpop.f32.mrf.mxu2  ;;  %v1990_v34 = vpop.f32.mrf.mxu0  ;;  %v5613_v2 = vld [vmem:[%s7237_s2 + $0x140] sm:$0xff] }
  0xde   : > { %3382 = vmatpush.bf16.msra.mxu1 %v5619_v3  ;;  %v2025_v32 = vadd.f32 %v2024_v30, %v2007_v26  ;;  %v2042_v33 = vpop.f32.mrf.mxu3  ;;  %v1991_v35 = vadd.f32 %v1990_v34, %v6621_v46  ;;  %v2008_v36 = vpop.f32.mrf.mxu1  ;;  %v5607_v46 = vld [vmem:[%s7237_s2 + $0x110] sm:$0xff]  ;;  %v5660_v3 = vld [vmem:[%s7237_s2 + $0x2b8] sm:$0xff] }
  0xdf   : > { %3400 = vmatpush.bf16.msra.mxu2 %v5627_v62  ;;  %v473_v26 = vld [vmem:[%s6080_s23 + $0xd0] sm:$0xff] }
  0xe0   : > { %3418 = vmatpush.bf16.msra.mxu3 %v5635_v5  ;;  %v6710_v38 = vadd.f32 %v2042_v33, %v2025_v32  ;;  %v2009_v41 = vadd.f32 %v2008_v36, %v1991_v35  ;;  %v5605_v5 = vld [vmem:[%s7237_s2 + $0x100] sm:$0xff]  ;;  %v5666_v32 = vld [vmem:[%s7237_s2 + $0x2e8] sm:$0xff] }
  0xe1   : > { %3365 = vmatpush.bf16.msra.mxu0 %v5610_v22  ;;  %v472_v22 = vld [vmem:[%s6080_s23 + $0xc8] sm:$0xff] }
  0xe2   : > { %3383 = vmatpush.bf16.msra.mxu1 %v5618_v15 }
  0xe3   : > { %3401 = vmatpush.bf16.msra.mxu2 %v5626_v6  ;;  %v5629_v6 = vld [vmem:[%s7237_s2 + $0x1c0] sm:$0xff] }
  0xe4   : > { %3419 = vmatpush.bf16.msra.mxu3 %v5634_v24  ;;  %v5650_v24 = vld [vmem:[%s7237_s2 + $0x268] sm:$0xff] }
  0xe5   : > { %3366 = vmatpush.bf16.msra.mxu0 %v5609_v27  ;;  %v2026_v50 = vpop.f32.mrf.mxu2  ;;  %v1993_v55 = vpop.f32.mrf.mxu0  ;;  %v474_v27 = vld [vmem:[%s6080_s23 + $0xd8] sm:$0xff] }
  0xe6   : > { %3384 = vmatpush.bf16.msra.mxu1 %v5617_v23  ;;  %v2027_v53 = vadd.f32 %v2026_v50, %v2009_v41  ;;  %v2044_v54 = vpop.f32.mrf.mxu3  ;;  %v1994_v58 = vadd.f32 %v1993_v55, %v6656_v63  ;;  %v2011_v59 = vpop.f32.mrf.mxu1  ;;  %v509_v23 = vld [vmem:[%s6080_s23 + $0x1f0] sm:$0xff]  ;;  %v5657_v41 = vld [vmem:[%s7237_s2 + $0x2a0] sm:$0xff] }
  0xe7   : > { %3402 = vmatpush.bf16.msra.mxu2 %v5625_v25  ;;  %v508_v25 = vld [vmem:[%s6080_s23 + $0x1e8] sm:$0xff]  ;;  %v601_v36 = vpack.c.bf16 %v509_v23, %v473_v26  ;;  %v5655_v55 = vld [vmem:[%s7237_s2 + $0x290] sm:$0xff] }
  0xe8   : > { %3420 = vmatpush.bf16.msra.mxu3 %v5633_v28  ;;  %v6741_v62 = vadd.f32 %v2044_v54, %v2027_v53  ;;  %v2012_v63 = vadd.f32 %v2011_v59, %v1994_v58  ;;  %3304 = vmatmul.bf16.gmra.mxu0 %v611_v51  ;;  %v510_v28 = vld [vmem:[%s6080_s23 + $0x1f8] sm:$0xff]  ;;  %v600_v35 = vpack.c.bf16 %v508_v25, %v472_v22  ;;  %v5647_v58 = vld [vmem:[%s7237_s2 + $0x250] sm:$0xff] }
  0xe9   : > { %3367 = vmatpush.bf16.msra.mxu0 %v5608_v37  ;;  %3322 = vmatmul.bf16.gmra.mxu1 %v612_v56  ;;  %v5676_v22 = vld [vmem:[%s7237_s2 + $0x338] sm:$0xff]  ;;  %v5691_v23 = vld [vmem:[%s7237_s2 + $0x3b0] sm:$0xff] }
  0xea   : > { %3385 = vmatpush.bf16.msra.mxu1 %v5616_v31  ;;  %3340 = vmatmul.bf16.gmra.mxu2 %v613_v57  ;;  %v599_v31 = vpack.c.bf16 %v507_v21, %v471_v18  ;;  %v5639_v57 = vld [vmem:[%s7237_s2 + $0x210] sm:$0xff]  ;;  %v5637_v18 = vld [vmem:[%s7237_s2 + $0x200] sm:$0xff]  ;;  %v5692_v21 = vld [vmem:[%s7237_s2 + $0x3b8] sm:$0xff] }
  0xeb   : > { %3403 = vmatpush.bf16.msra.mxu2 %v5624_v29  ;;  %3358 = vmatmul.bf16.gmra.mxu3 %v614_v60  ;;  %v5642_v29 = vld [vmem:[%s7237_s2 + $0x228] sm:$0xff]  ;;  %v5663_v60 = vld [vmem:[%s7237_s2 + $0x2d0] sm:$0xff]  ;;  %v5700_v25 = vld [vmem:[%s7237_s2 + $0x3f8] sm:$0xff] }
  0xec   : > { %3421 = vmatpush.bf16.msra.mxu3 %v5632_v39 }
  0xed   : > { %3368 = vmatpush.bf16.msra.mxu0 %v5607_v46  ;;  %v2029_v8 = vpop.f32.mrf.mxu2  ;;  %v1995_v13 = vpop.f32.mrf.mxu0  ;;  %v5640_v46 = vld [vmem:[%s7237_s2 + $0x218] sm:$0xff] }
  0xee   : > { %3386 = vmatpush.bf16.msra.mxu1 %v5615_v42  ;;  %v2030_v11 = vadd.f32 %v2029_v8, %v2012_v63  ;;  %v2047_v12 = vpop.f32.mrf.mxu3  ;;  %v2013_v15 = vpop.f32.mrf.mxu1  ;;  %v5641_v42 = vld [vmem:[%s7237_s2 + $0x220] sm:$0xff]  ;;  %v546_v63 = vld [vmem:[%s6080_s23 + $0x318] sm:$0xff] }
  0xef   : > { %3404 = vmatpush.bf16.msra.mxu2 %v5623_v40  ;;  %v602_v40 = vpack.c.bf16 %v510_v28, %v474_v27  ;;  %v5653_v15 = vld [vmem:[%s7237_s2 + $0x280] sm:$0xff] }
  0xf0   : > { %3422 = vmatpush.bf16.msra.mxu3 %v5631_v48  ;;  %v6776_v16 = vadd.f32 %v2047_v12, %v2030_v11 }
  0xf1   : > { %3369 = vmatpush.bf16.msra.mxu0 %v5606_v61  ;;  %v543_v61 = vld [vmem:[%s6080_s23 + $0x300] sm:$0xff] }
  0xf2   : > { %3387 = vmatpush.bf16.msra.mxu1 %v5614_v52 }
  0xf3   : > { %3405 = vmatpush.bf16.msra.mxu2 %v5622_v49  ;;  %v5664_v49 = vld [vmem:[%s7237_s2 + $0x2d8] sm:$0xff] }
  0xf4   : > { %3423 = vmatpush.bf16.msra.mxu3 %v5630_v0  ;;  %v545_v0 = vld [vmem:[%s6080_s23 + $0x310] sm:$0xff] }
  0xf5   : > { %3370 = vmatpush.bf16.msra.mxu0 %v5605_v5  ;;  %v2031_v30 = vpop.f32.mrf.mxu2  ;;  %v2060_v34 = vpop.f32.mrf.mxu0  ;;  %v615_v5 = vpack.c.bf16 %v543_v61, %v543_v61  ;;  %v617_v11 = vpack.c.bf16 %v545_v0, %v545_v0  ;;  %v5680_v0 = vld [vmem:[%s7237_s2 + $0x358] sm:$0xff] }
  0xf6   : > { %3388 = vmatpush.bf16.msra.mxu1 %v5613_v2  ;;  %v2049_v33 = vpop.f32.mrf.mxu3  ;;  %v2061_v37 = vadd.f32 %v2060_v34, %v6710_v38  ;;  %v2078_v39 = vpop.f32.mrf.mxu1  ;;  %v5665_v38 = vld [vmem:[%s7237_s2 + $0x2e0] sm:$0xff]  ;;  %v5638_v2 = vld [vmem:[%s7237_s2 + $0x208] sm:$0xff]  ;;  %v5675_v30 = vld [vmem:[%s7237_s2 + $0x330] sm:$0xff] }
  0xf7   : > { %3406 = vmatpush.bf16.msra.mxu2 %v5621_v1  ;;  %v5654_v1 = vld [vmem:[%s7237_s2 + $0x288] sm:$0xff]  ;;  %v5699_v33 = vld [vmem:[%s7237_s2 + $0x3f0] sm:$0xff] }
  0xf8   : > { %3424 = vmatpush.bf16.msra.mxu3 %v5629_v6  ;;  %v2079_v44 = vadd.f32 %v2078_v39, %v2061_v37  ;;  %3371 = vmatmul.bf16.vlgmr.msra.gmra.mxu0 %v599_v31  ;;  %v5662_v6 = vld [vmem:[%s7237_s2 + $0x2c8] sm:$0xff]  ;;  %v5683_v31 = vld [vmem:[%s7237_s2 + $0x370] sm:$0xff] }
  0xf9   : > { %3435 = vmatpush.bf16.msrb.mxu0 %v5644_v7  ;;  %3389 = vmatmul.bf16.vlgmr.msra.gmra.mxu1 %v600_v35  ;;  %v475_v35 = vld [vmem:[%s6080_s23 + $0xe0] sm:$0xff]  ;;  %v476_v37 = vld [vmem:[%s6080_s23 + $0xe8] sm:$0xff] }
  0xfa   : > { %3453 = vmatpush.bf16.msrb.mxu1 %v5652_v4  ;;  %3407 = vmatmul.bf16.vlgmr.msra.gmra.mxu2 %v601_v36  ;;  %v511_v36 = vld [vmem:[%s6080_s23 + $0x200] sm:$0xff]  ;;  %v5690_v39 = vld [vmem:[%s7237_s2 + $0x3a8] sm:$0xff] }
  0xfb   : > { %3471 = vmatpush.bf16.msrb.mxu2 %v5660_v3  ;;  %3425 = vmatmul.bf16.vlgmr.msra.gmra.mxu3 %v602_v40  ;;  %v5646_v3 = vld [vmem:[%s7237_s2 + $0x248] sm:$0xff] }
  0xfc   : > { %3489 = vmatpush.bf16.msrb.mxu3 %v5668_v9  ;;  %v512_v40 = vld [vmem:[%s6080_s23 + $0x208] sm:$0xff] }
  0xfd   : > { %3436 = vmatpush.bf16.msrb.mxu0 %v5643_v17  ;;  %v2096_v48 = vpop.f32.mrf.mxu2  ;;  %v2062_v52 = vpop.f32.mrf.mxu0 }
  0xfe   : > { %3454 = vmatpush.bf16.msrb.mxu1 %v5651_v14  ;;  %v2097_v50 = vadd.f32 %v2096_v48, %v2079_v44  ;;  %v2114_v51 = vpop.f32.mrf.mxu3  ;;  %v2063_v53 = vadd.f32 %v2062_v52, %v6741_v62  ;;  %v2080_v54 = vpop.f32.mrf.mxu1  ;;  %v544_v62 = vld [vmem:[%s6080_s23 + $0x308] sm:$0xff]  ;;  %v618_v14 = vpack.c.bf16 %v546_v63, %v546_v63  ;;  %v513_v44 = vld [vmem:[%s6080_s23 + $0x210] sm:$0xff]  ;;  %v603_v48 = vpack.c.bf16 %v511_v36, %v475_v35 }
  0xff   : > { %3472 = vmatpush.bf16.msrb.mxu2 %v5659_v10  ;;  %v616_v10 = vpack.c.bf16 %v544_v62, %v544_v62  ;;  %v604_v52 = vpack.c.bf16 %v512_v40, %v476_v37  ;;  %v5672_v62 = vld [vmem:[%s7237_s2 + $0x318] sm:$0xff] }
 0x100   : > { %3490 = vmatpush.bf16.msrb.mxu3 %v5667_v19  ;;  %v6833_v56 = vadd.f32 %v2114_v51, %v2097_v50  ;;  %v2081_v59 = vadd.f32 %v2080_v54, %v2063_v53  ;;  %v5645_v19 = vld [vmem:[%s7237_s2 + $0x240] sm:$0xff] }
 0x101   : > { %3437 = vmatpush.bf16.msrb.mxu0 %v5642_v29 }
 0x102   : > { %3455 = vmatpush.bf16.msrb.mxu1 %v5650_v24  ;;  %v5684_v24 = vld [vmem:[%s7237_s2 + $0x378] sm:$0xff] }
 0x103   : > { %3473 = vmatpush.bf16.msrb.mxu2 %v5658_v20  ;;  %v5661_v20 = vld [vmem:[%s7237_s2 + $0x2c0] sm:$0xff] }
 0x104   : > { %3491 = vmatpush.bf16.msrb.mxu3 %v5666_v32 }
 0x105   : > { %3438 = vmatpush.bf16.msrb.mxu0 %v5641_v42  ;;  %v2098_v4 = vpop.f32.mrf.mxu2  ;;  %v2065_v9 = vpop.f32.mrf.mxu0  ;;  %v5682_v42 = vld [vmem:[%s7237_s2 + $0x368] sm:$0xff] }
 0x106   : > { %3456 = vmatpush.bf16.msrb.mxu1 %v5649_v43  ;;  %v2099_v7 = vadd.f32 %v2098_v4, %v2081_v59  ;;  %v2116_v8 = vpop.f32.mrf.mxu3  ;;  %v2066_v12 = vadd.f32 %v2065_v9, %v6776_v16  ;;  %v2083_v13 = vpop.f32.mrf.mxu1  ;;  %v477_v43 = vld [vmem:[%s6080_s23 + $0xf0] sm:$0xff]  ;;  %v5681_v59 = vld [vmem:[%s7237_s2 + $0x360] sm:$0xff] }
 0x107   : > { %3474 = vmatpush.bf16.msrb.mxu2 %v5657_v41  ;;  %v5674_v41 = vld [vmem:[%s7237_s2 + $0x328] sm:$0xff]  ;;  %v605_v53 = vpack.c.bf16 %v513_v44, %v477_v43  ;;  %v5679_v9 = vld [vmem:[%s7237_s2 + $0x350] sm:$0xff] }
 0x108   : > { %3492 = vmatpush.bf16.msrb.mxu3 %v5665_v38  ;;  %v6864_v17 = vadd.f32 %v2116_v8, %v2099_v7  ;;  %v2084_v16 = vadd.f32 %v2083_v13, %v2066_v12  ;;  %3376 = vmatmul.bf16.gmra.mxu0 %v615_v5  ;;  %v5698_v38 = vld [vmem:[%s7237_s2 + $0x3e8] sm:$0xff]  ;;  %v5671_v7 = vld [vmem:[%s7237_s2 + $0x310] sm:$0xff]  ;;  %v547_v12 = vld [vmem:[%s6080_s23 + $0x320] sm:$0xff] }
 0x109   : > { %3439 = vmatpush.bf16.msrb.mxu0 %v5640_v46  ;;  %3394 = vmatmul.bf16.gmra.mxu1 %v616_v10  ;;  %v514_v46 = vld [vmem:[%s6080_s23 + $0x218] sm:$0xff]  ;;  %v5695_v10 = vld [vmem:[%s7237_s2 + $0x3d0] sm:$0xff]  ;;  %v548_v13 = vld [vmem:[%s6080_s23 + $0x328] sm:$0xff] }
 0x10a   : > { %3457 = vmatpush.bf16.msrb.mxu1 %v5648_v47  ;;  %3412 = vmatmul.bf16.gmra.mxu2 %v617_v11  ;;  %v5686_v11 = vld [vmem:[%s7237_s2 + $0x388] sm:$0xff] }
 0x10b   : > { %3475 = vmatpush.bf16.msrb.mxu2 %v5656_v45  ;;  %3430 = vmatmul.bf16.gmra.mxu3 %v618_v14  ;;  %v478_v45 = vld [vmem:[%s6080_s23 + $0xf8] sm:$0xff]  ;;  %v549_v14 = vld [vmem:[%s6080_s23 + $0x330] sm:$0xff]  ;;  %v480_v43 = vld [vmem:[%s6080_s23 + $0x108] sm:$0xff] }
 0x10c   : > { %3493 = vmatpush.bf16.msrb.mxu3 %v5664_v49  ;;  %v5689_v49 = vld [vmem:[%s7237_s2 + $0x3a0] sm:$0xff] }
 0x10d   : > { %3440 = vmatpush.bf16.msrb.mxu0 %v5639_v57  ;;  %v2101_v26 = vpop.f32.mrf.mxu2  ;;  %v2067_v29 = vpop.f32.mrf.mxu0  ;;  %v606_v57 = vpack.c.bf16 %v514_v46, %v478_v45  ;;  %v481_v45 = vld [vmem:[%s6080_s23 + $0x110] sm:$0xff] }
 0x10e   : > { %3458 = vmatpush.bf16.msrb.mxu1 %v5647_v58  ;;  %v2102_v27 = vadd.f32 %v2101_v26, %v2084_v16  ;;  %v2119_v28 = vpop.f32.mrf.mxu3  ;;  %v2085_v32 = vpop.f32.mrf.mxu1  ;;  %v5673_v58 = vld [vmem:[%s7237_s2 + $0x320] sm:$0xff]  ;;  %v5694_v16 = vld [vmem:[%s7237_s2 + $0x3c8] sm:$0xff]  ;;  %v620_v26 = vpack.c.bf16 %v548_v13, %v548_v13  ;;  %v517_v46 = vld [vmem:[%s6080_s23 + $0x230] sm:$0xff] }
 0x10f   : > { %3476 = vmatpush.bf16.msrb.mxu2 %v5655_v55  ;;  %v5693_v32 = vld [vmem:[%s7237_s2 + $0x3c0] sm:$0xff] }
 0x110   : > { %3494 = vmatpush.bf16.msrb.mxu3 %v5663_v60  ;;  %v6899_v34 = vadd.f32 %v2119_v28, %v2102_v27  ;;  %v5697_v60 = vld [vmem:[%s7237_s2 + $0x3e0] sm:$0xff] }
 0x111   : > { %3441 = vmatpush.bf16.msrb.mxu0 %v5638_v2  ;;  %v5687_v2 = vld [vmem:[%s7237_s2 + $0x390] sm:$0xff] }
 0x112   : > { %3459 = vmatpush.bf16.msrb.mxu1 %v5646_v3 }
 0x113   : > { %3477 = vmatpush.bf16.msrb.mxu2 %v5654_v1  ;;  %v5696_v1 = vld [vmem:[%s7237_s2 + $0x3d8] sm:$0xff] }
 0x114   : > { %3495 = vmatpush.bf16.msrb.mxu3 %v5662_v6 }
 0x115   : > { %3442 = vmatpush.bf16.msrb.mxu0 %v5637_v18  ;;  %v2103_v47 = vpop.f32.mrf.mxu2  ;;  %v2132_v51 = vpop.f32.mrf.mxu0  ;;  %v550_v18 = vld [vmem:[%s6080_s23 + $0x338] sm:$0xff] }
 0x116   : > { %3460 = vmatpush.bf16.msrb.mxu1 %v5645_v19  ;;  %v2121_v50 = vpop.f32.mrf.mxu3  ;;  %v2133_v54 = vadd.f32 %v2132_v51, %v6833_v56  ;;  %v2150_v55 = vpop.f32.mrf.mxu1  ;;  %v5688_v56 = vld [vmem:[%s7237_s2 + $0x398] sm:$0xff]  ;;  %v5678_v19 = vld [vmem:[%s7237_s2 + $0x348] sm:$0xff]  ;;  %v622_v29 = vpack.c.bf16 %v550_v18, %v550_v18 }
 0x117   : > { %3478 = vmatpush.bf16.msrb.mxu2 %v5653_v15  ;;  %v5670_v15 = vld [vmem:[%s7237_s2 + $0x308] sm:$0xff]  ;;  %v482_v47 = vld [vmem:[%s6080_s23 + $0x118] sm:$0xff] }
 0x118   : > { %3496 = vmatpush.bf16.msrb.mxu3 %v5661_v20  ;;  %v2151_v61 = vadd.f32 %v2150_v55, %v2133_v54  ;;  %3443 = vmatmul.bf16.vlgmr.msrb.gmra.mxu0 %v603_v48  ;;  %v518_v48 = vld [vmem:[%s6080_s23 + $0x238] sm:$0xff]  ;;  %v609_v54 = vpack.c.bf16 %v517_v46, %v481_v45 }
 0x119   : > { %3507 = vmatpush.bf16.msra.mxu0 %v5676_v22  ;;  %3461 = vmatmul.bf16.vlgmr.msrb.gmra.mxu1 %v604_v52  ;;  %v5685_v22 = vld [vmem:[%s7237_s2 + $0x380] sm:$0xff] }
 0x11a   : > { %3525 = vmatpush.bf16.msra.mxu1 %v5684_v24  ;;  %3479 = vmatmul.bf16.vlgmr.msrb.gmra.mxu2 %v605_v53 }
 0x11b   : > { %3543 = vmatpush.bf16.msra.mxu2 %v5692_v21  ;;  %3497 = vmatmul.bf16.vlgmr.msrb.gmra.mxu3 %v606_v57  ;;  %v619_v21 = vpack.c.bf16 %v547_v12, %v547_v12 }
 0x11c   : > { %3561 = vmatpush.bf16.msra.mxu3 %v5700_v25 }
 0x11d   : > { %3508 = vmatpush.bf16.msra.mxu0 %v5675_v30  ;;  %v2168_v63 = vpop.f32.mrf.mxu2  ;;  %v2134_v5 = vpop.f32.mrf.mxu0  ;;  %v5669_v30 = vld [vmem:[%s7237_s2 + $0x300] sm:$0xff] }
 0x11e   : > { %3526 = vmatpush.bf16.msra.mxu1 %v5683_v31  ;;  %v2169_v3 = vadd.f32 %v2168_v63, %v2151_v61  ;;  %v2186_v4 = vpop.f32.mrf.mxu3  ;;  %v6949_v6 = vpop.f32.mrf.mxu1  ;;  %v5677_v31 = vld [vmem:[%s7237_s2 + $0x340] sm:$0xff]  ;;  %v2135_v44 = vadd.f32 %v2134_v5, %v6864_v17 }
 0x11f   : > { %3544 = vmatpush.bf16.msra.mxu2 %v5691_v23  ;;  %v621_v23 = vpack.c.bf16 %v549_v14, %v549_v14  ;;  %v551_v5 = vld [vmem:[%s6080_s23 + $0x340] sm:$0xff] }
 0x120   : > { %3562 = vmatpush.bf16.msra.mxu3 %v5699_v33  ;;  %v6954_v8 = vadd.f32 %v2186_v4, %v2169_v3  ;;  %v2153_v55 = vadd.f32 %v6949_v6, %v2135_v44  ;;  %v552_v6 = vld [vmem:[%s6080_s23 + $0x348] sm:$0xff] }
 0x121   : > { %3509 = vmatpush.bf16.msra.mxu0 %v5674_v41  ;;  %v479_v41 = vld [vmem:[%s6080_s23 + $0x100] sm:$0xff]  ;;  %v624_v14 = vpack.c.bf16 %v552_v6, %v552_v6 }
 0x122   : > { %3527 = vmatpush.bf16.msra.mxu1 %v5682_v42  ;;  %v515_v42 = vld [vmem:[%s6080_s23 + $0x220] sm:$0xff] }
 0x123   : > { %3545 = vmatpush.bf16.msra.mxu2 %v5690_v39  ;;  %v607_v50 = vpack.c.bf16 %v515_v42, %v479_v41 }
 0x124   : > { %3563 = vmatpush.bf16.msra.mxu3 %v5698_v38  ;;  %v516_v38 = vld [vmem:[%s6080_s23 + $0x228] sm:$0xff] }
 0x125   : > { %3510 = vmatpush.bf16.msra.mxu0 %v5673_v58  ;;  %v2170_v20 = vpop.f32.mrf.mxu2  ;;  %v2137_v25 = vpop.f32.mrf.mxu0  ;;  %v608_v53 = vpack.c.bf16 %v516_v38, %v480_v43 }
 0x126   : > { %3528 = vmatpush.bf16.msra.mxu1 %v5681_v59  ;;  %v2188_v24 = vpop.f32.mrf.mxu3  ;;  %v2138_v27 = vadd.f32 %v2137_v25, %v6899_v34  ;;  %v2155_v28 = vpop.f32.mrf.mxu1  ;;  %v610_v59 = vpack.c.bf16 %v518_v48, %v482_v47 }
 0x127   : > { %3546 = vmatpush.bf16.msra.mxu2 %v5689_v49 }
 0x128   : > { %3564 = vmatpush.bf16.msra.mxu3 %v5697_v60  ;;  %v2156_v33 = vadd.f32 %v2155_v28, %v2138_v27  ;;  %3448 = vmatmul.bf16.gmra.mxu0 %v619_v21  ;;  %v2171_v60 = vadd.f32 %v2170_v20, %v2153_v55 }
 0x129   : > { %3511 = vmatpush.bf16.msra.mxu0 %v5672_v62  ;;  %3466 = vmatmul.bf16.gmra.mxu1 %v620_v26 }
 0x12a   : > { %3529 = vmatpush.bf16.msra.mxu1 %v5680_v0  ;;  %3484 = vmatmul.bf16.gmra.mxu2 %v621_v23  ;;  %v2189_v61 = vadd.f32 %v2188_v24, %v2171_v60 }
 0x12b   : > { %3547 = vmatpush.bf16.msra.mxu2 %v5688_v56  ;;  %3502 = vmatmul.bf16.gmra.mxu3 %v622_v29 }
 0x12c   : > { %3565 = vmatpush.bf16.msra.mxu3 %v5696_v1 }
 0x12d   : > { %3512 = vmatpush.bf16.msra.mxu0 %v5671_v7  ;;  %v2173_v34 = vpop.f32.mrf.mxu2  ;;  %v2139_v37 = vpop.f32.mrf.mxu0  ;;  %v553_v7 = vld [vmem:[%s6080_s23 + $0x350] sm:$0xff] }
 0x12e   : > { %3530 = vmatpush.bf16.msra.mxu1 %v5679_v9  ;;  %v2174_v35 = vadd.f32 %v2173_v34, %v2156_v33  ;;  %v2191_v36 = vpop.f32.mrf.mxu3  ;;  %v2157_v39 = vpop.f32.mrf.mxu1 }
 0x12f   : > { %3548 = vmatpush.bf16.msra.mxu2 %v5687_v2 }
 0x130   : > { %3566 = vmatpush.bf16.msra.mxu3 %v5695_v10  ;;  %v2192_v40 = vadd.f32 %v2191_v36, %v2174_v35  ;;  %v623_v10 = vpack.c.bf16 %v551_v5, %v551_v5 }
 0x131   : > { %3513 = vmatpush.bf16.msra.mxu0 %v5670_v15  ;;  %v625_v15 = vpack.c.bf16 %v553_v7, %v553_v7 }
 0x132   : > { %3531 = vmatpush.bf16.msra.mxu1 %v5678_v19 }
 0x133   : > { %3549 = vmatpush.bf16.msra.mxu2 %v5686_v11 }
 0x134   : > { %3567 = vmatpush.bf16.msra.mxu3 %v5694_v16 }
 0x135   : > { %3514 = vmatpush.bf16.msra.mxu0 %v5669_v30  ;;  %v2175_v49 = vpop.f32.mrf.mxu2  ;;  %v2204_v52 = vpop.f32.mrf.mxu0 }
 0x136   : > { %3532 = vmatpush.bf16.msra.mxu1 %v5677_v31  ;;  %v2193_v51 = vpop.f32.mrf.mxu3  ;;  %v2205_v57 = vadd.f32 %v2204_v52, %v6954_v8  ;;  %v2222_v58 = vpop.f32.mrf.mxu1  ;;  %v554_v8 = vld [vmem:[%s6080_s23 + $0x358] sm:$0xff]  ;;  %s422_s23 = sand.u32 1, %s5863_s22  }
 0x137   : > { %3550 = vmatpush.bf16.msra.mxu2 %v5685_v22  ;;  %v626_v16 = vpack.c.bf16 %v554_v8, %v554_v8  ;;  %s5734_s18 = smul.u32 24, %s422_s23  ;;  %s7175_s27 = scalar_lea.sflag [#allocation3], %s422_s23 }
 0x138   : > { %3568 = vmatpush.bf16.msra.mxu3 %v5693_v32  ;;  %v2223_v17 = vadd.f32 %v2222_v58, %v2205_v57  ;;  %3515 = vmatmul.bf16.vlgmr.msra.gmra.mxu0 %v607_v50 }
 0x139   : > { %3533 = vmatmul.bf16.vlgmr.msra.gmra.mxu1 %v608_v53  ;;  %s424_s20 = scalar_lea.vmem [#allocation2], %s5734_s18 }
 0x13a   : > { %3551 = vmatmul.bf16.vlgmr.msra.gmra.mxu2 %v609_v54 }
 0x13b   : > { %3569 = vmatmul.bf16.vlgmr.msra.gmra.mxu3 %v610_v59 }
 0x13d   : > { %v2240_v56 = vpop.f32.mrf.mxu2  ;;  %v2206_v1 = vpop.f32.mrf.mxu0 }
 0x13e   : > { %v2241_v62 = vadd.f32 %v2240_v56, %v2223_v17  ;;  %v2258_v0 = vpop.f32.mrf.mxu3  ;;  %v2207_v63 = vadd.f32 %v2206_v1, %v2189_v61  ;;  %v2224_v2 = vpop.f32.mrf.mxu1 }
 0x140   : > { %v7002_v3 = vadd.f32 %v2258_v0, %v2241_v62  ;;  %v2225_v4 = vadd.f32 %v2224_v2, %v2207_v63 }
 0x145   : > { %v2242_v9 = vpop.f32.mrf.mxu2  ;;  %v2209_v13 = vpop.f32.mrf.mxu0 }
 0x146   : > { %v2243_v11 = vadd.f32 %v2242_v9, %v2225_v4  ;;  %v2260_v12 = vpop.f32.mrf.mxu3  ;;  %v2210_v18 = vadd.f32 %v2209_v13, %v2192_v40  ;;  %v2227_v19 = vpop.f32.mrf.mxu1 }
 0x148   : > { %v7008_v20 = vadd.f32 %v2260_v12, %v2243_v11  ;;  %v2228_v21 = vadd.f32 %v2227_v19, %v2210_v18  ;;  %3520 = vmatmul.bf16.gmra.mxu0 %v623_v10 }
 0x149   : > { %3538 = vmatmul.bf16.gmra.mxu1 %v624_v14 }
 0x14a   : > { %3556 = vmatmul.bf16.gmra.mxu2 %v625_v15 }
 0x14b   : > { %3574 = vmatmul.bf16.gmra.mxu3 %v626_v16 }
 0x14d   : > { %v2245_v22 = vpop.f32.mrf.mxu2  ;;  %v2211_v26 = vpop.f32.mrf.mxu0 }
 0x14e   : > { %v2246_v24 = vadd.f32 %v2245_v22, %v2228_v21  ;;  %v2263_v25 = vpop.f32.mrf.mxu3  ;;  %v2229_v23 = vpop.f32.mrf.mxu1 }
 0x150   : > { %v7010_v27 = vadd.f32 %v2263_v25, %v2246_v24 }
 0x155   : > { %v2247_v28 = vpop.f32.mrf.mxu2  ;;  %v3300_v30 = vpop.f32.mrf.mxu0 }
 0x156   : > { %v2265_v29 = vpop.f32.mrf.mxu3  ;;  %v3318_v31 = vpop.f32.mrf.mxu1 }
 0x157   : > { %v3319_v32 = vadd.f32 %v3318_v31, %v3300_v30 }
 0x15d   : > { %v3336_v33 = vpop.f32.mrf.mxu2  ;;  %v3302_v36 = vpop.f32.mrf.mxu0 }
 0x15e   : > { %v3337_v34 = vadd.f32 %v3336_v33, %v3319_v32  ;;  %v3354_v35 = vpop.f32.mrf.mxu3  ;;  %v3320_v37 = vpop.f32.mrf.mxu1 }
 0x15f   : > { %v3321_v40 = vadd.f32 %v3320_v37, %v3302_v36 }
 0x160   : > { %v3355_v39 = vadd.f32 %v3354_v35, %v3337_v34 }
 0x165   : > { %v3338_v41 = vpop.f32.mrf.mxu2  ;;  %v3305_v44 = vpop.f32.mrf.mxu0 }
 0x166   : > { %v3339_v42 = vadd.f32 %v3338_v41, %v3321_v40  ;;  %v3356_v43 = vpop.f32.mrf.mxu3  ;;  %v3323_v38 = vpop.f32.mrf.mxu1 }
 0x167   : > { %v3324_v46 = vadd.f32 %v3323_v38, %v3305_v44 }
 0x168   : > { %v3357_v45 = vadd.f32 %v3356_v43, %v3339_v42 }
 0x16d   : > { %v3341_v47 = vpop.f32.mrf.mxu2  ;;  %v3307_v50 = vpop.f32.mrf.mxu0 }
 0x16e   : > { %v3342_v48 = vadd.f32 %v3341_v47, %v3324_v46  ;;  %v3359_v49 = vpop.f32.mrf.mxu3  ;;  %v3325_v51 = vpop.f32.mrf.mxu1  ;;  %v3579_v46 = vld [vmem:[%s7238_s3] sm:$0x3] }
 0x170   : > { %v3360_v52 = vadd.f32 %v3359_v49, %v3342_v48  ;;  %v3581_v49 = vperm.slane %v3579_v46, 0 }
 0x175   : > { %v3343_v53 = vpop.f32.mrf.mxu2  ;;  %v3372_v55 = vpop.f32.mrf.mxu0 }
 0x176   : > { %v3361_v54 = vpop.f32.mrf.mxu3  ;;  %v3390_v57 = vpop.f32.mrf.mxu1  ;;  %v3373_v13 = vadd.f32 %v3372_v55, %v3355_v39 }
 0x178   : > { %v3391_v14 = vadd.f32 %v3390_v57, %v3373_v13  ;;  %v3582_v57 = vperm.slane %v3579_v46, 1 }
 0x17d   : > { %v3408_v58 = vpop.f32.mrf.mxu2  ;;  %v3374_v60 = vpop.f32.mrf.mxu0 }
 0x17e   : > { %v3426_v59 = vpop.f32.mrf.mxu3  ;;  %v3392_v17 = vpop.f32.mrf.mxu1  ;;  %v3409_v18 = vadd.f32 %v3408_v58, %v3391_v14  ;;  %v3375_v22 = vadd.f32 %v3374_v60, %v3357_v45  ;;  %v7016_v60 = vadd.f32 %v3581_v49, %v7002_v3 }
 0x180   : > { %v3427_v24 = vadd.f32 %v3426_v59, %v3409_v18  ;;  %v3393_v25 = vadd.f32 %v3392_v17, %v3375_v22 }
 0x185   : > { %v3410_v61 = vpop.f32.mrf.mxu2  ;;  %v3377_v62 = vpop.f32.mrf.mxu0 }
 0x186   : > { %v3428_v56 = vpop.f32.mrf.mxu3  ;;  %v3395_v0 = vpop.f32.mrf.mxu1  ;;  %v3411_v28 = vadd.f32 %v3410_v61, %v3393_v25  ;;  %v3378_v32 = vadd.f32 %v3377_v62, %v3360_v52 }
 0x188   : > { %v3429_v34 = vadd.f32 %v3428_v56, %v3411_v28  ;;  %v3396_v36 = vadd.f32 %v3395_v0, %v3378_v32  ;;  %v7038_v28 = vadd.f32 %v3581_v49, %v7010_v27 }
 0x18d   : > { %v3413_v1 = vpop.f32.mrf.mxu2  ;;  %v3379_v2 = vpop.f32.mrf.mxu0 }
 0x18e   : > { %v3431_v63 = vpop.f32.mrf.mxu3  ;;  %v3397_v4 = vpop.f32.mrf.mxu1  ;;  %v3414_v40 = vadd.f32 %v3413_v1, %v3396_v36  ;;  %v3612_v2 = vmul.f32 %v7016_v60, %v7016_v60  ;;  %v5873_v36 = vmov 256.0  }
 0x18f   : > { %5782 = vrcp.f32 %v5873_v36 }
 0x190   : > { %v3432_v47 = vadd.f32 %v3431_v63, %v3414_v40  ;;  %v5716_v40 = vld [vmem:[%s7241_s6 + $0x78] sm:$0xff] }
 0x191   : > { %3866 = vmatpush.bf16.msrb.mxu1 %v5716_v40 }
 0x195   : > { %v3415_v5 = vpop.f32.mrf.mxu2  ;;  %v3444_v7 = vpop.f32.mrf.mxu0 }
 0x196   : > { %v3433_v6 = vpop.f32.mrf.mxu3  ;;  %v3462_v8 = vpop.f32.mrf.mxu1  ;;  %v3445_v26 = vadd.f32 %v3444_v7, %v3427_v24 }
 0x197   : > { %v5783_v27 = vpop.eup %5782 }
 0x198   : > { %v3463_v33 = vadd.f32 %v3462_v8, %v3445_v26  ;;  %vm3607_vm0 = vweird.f32 %v5783_v27 }
 0x19d   : > { %v3480_v9 = vpop.f32.mrf.mxu2  ;;  %v3446_v11 = vpop.f32.mrf.mxu0 }
 0x19e   : > { %v3498_v10 = vpop.f32.mrf.mxu3  ;;  %v3464_v12 = vpop.f32.mrf.mxu1  ;;  %v3481_v35 = vadd.f32 %v3480_v9, %v3463_v33  ;;  %v3447_v37 = vadd.f32 %v3446_v11, %v3429_v34  ;;  %v7027_v11 = vadd.f32 %v3581_v49, %v7008_v20  ;;  %v3616_v34 = vmul.f32 %v7038_v28, %v7038_v28 }
 0x1a0   : > { %v3499_v41 = vadd.f32 %v3498_v10, %v3481_v35  ;;  %v3465_v38 = vadd.f32 %v3464_v12, %v3447_v37  ;;  %v3603_v37 = vmul.f32 256.0, %v5783_v27 }
 0x1a5   : > { %v3482_v15 = vpop.f32.mrf.mxu2  ;;  %v3449_v16 = vpop.f32.mrf.mxu0 }
 0x1a6   : > { %v3500_v19 = vpop.f32.mrf.mxu3  ;;  %v3467_v21 = vpop.f32.mrf.mxu1  ;;  %v3483_v48 = vadd.f32 %v3482_v15, %v3465_v38  ;;  %v3450_v50 = vadd.f32 %v3449_v16, %v3432_v47  ;;  %v5706_v38 = vld [vmem:[%s7241_s6 + $0x28] sm:$0xff]  ;;  %v5705_v47 = vld [vmem:[%s7241_s6 + $0x20] sm:$0xff] }
 0x1a8   : > { %v3501_v53 = vadd.f32 %v3500_v19, %v3483_v48  ;;  %v3468_v17 = vadd.f32 %v3467_v21, %v3450_v50  ;;  %v3614_v19 = vmul.f32 %v7027_v11, %v7027_v11  ;;  %v5713_v48 = vld [vmem:[%s7241_s6 + $0x60] sm:$0xff]  ;;  %v5704_v50 = vld [vmem:[%s7241_s6 + $0x18] sm:$0xff] }
 0x1ad   : > { %v3485_v23 = vpop.f32.mrf.mxu2  ;;  %v3451_v30 = vpop.f32.mrf.mxu0 }
 0x1ae   : > { %v3503_v29 = vpop.f32.mrf.mxu3  ;;  %v3469_v31 = vpop.f32.mrf.mxu1  ;;  %v3486_v62 = vadd.f32 %v3485_v23, %v3468_v17 }
 0x1b0   : > { %v3504_v6 = vadd.f32 %v3503_v29, %v3486_v62  ;;  %v5710_v62 = vld [vmem:[%s7241_s6 + $0x48] sm:$0xff] }
 0x1b5   : > { %v3487_v39 = vpop.f32.mrf.mxu2  ;;  %v3516_v43 = vpop.f32.mrf.mxu0 }
 0x1b6   : > { %v3505_v42 = vpop.f32.mrf.mxu3  ;;  %v3534_v44 = vpop.f32.mrf.mxu1  ;;  %v3517_v45 = vadd.f32 %v3516_v43, %v3499_v41  ;;  %v5708_v39 = vld [vmem:[%s7241_s6 + $0x38] sm:$0xff]  ;;  %v3604_v41 = vsub.f32 1.0, %v3603_v37  ;;  %v5715_v43 = vld [vmem:[%s7241_s6 + $0x70] sm:$0xff] }
 0x1b7   : > { %3848 = vmatpush.bf16.msrb.mxu0 %v5708_v39  ;;  %5726 = vmatpush.bf16.msrb.mxu3 %v5708_v39  ;;  %v5707_v42 = vld [vmem:[%s7241_s6 + $0x30] sm:$0xff] }
 0x1b8   : > { %v3535_v51 = vadd.f32 %v3534_v44, %v3517_v45  ;;  %3867 = vmatpush.bf16.msrb.mxu1 %v5715_v43  ;;  %v3605_v44 = vmul.f32 %v5783_v27, %v3604_v41  ;;  %v5714_v45 = vld [vmem:[%s7241_s6 + $0x68] sm:$0xff]  ;;  %v3592_v43 = vld [vmem:[%s7240_s5] sm:$0x3] }
 0x1ba   : > { %v3606_v46 = vadd.f32 %v5783_v27, %v3605_v44 }
 0x1bb   : > { %3849 = vmatpush.bf16.msrb.mxu0 %v5707_v42  ;;  %5727 = vmatpush.bf16.msrb.mxu3 %v5707_v42 }
 0x1bc   : > { %3868 = vmatpush.bf16.msrb.mxu1 %v5714_v45  ;;  %v3608_v49 = vsel %vm3607_vm0, %v5783_v27, %v3606_v46  ;;  %v3696_v45 = vperm.slane %v3592_v43, 0 }
 0x1bd   : > { %v3552_v52 = vpop.f32.mrf.mxu2  ;;  %v3518_v58 = vpop.f32.mrf.mxu0 }
 0x1be   : > { %v3553_v54 = vadd.f32 %v3552_v52, %v3535_v51  ;;  %v3570_v55 = vpop.f32.mrf.mxu3  ;;  %v3536_v59 = vpop.f32.mrf.mxu1  ;;  %v3519_v56 = vadd.f32 %v3518_v58, %v3501_v53  ;;  %v5712_v51 = vld [vmem:[%s7241_s6 + $0x58] sm:$0xff]  ;;  %v5703_v58 = vld [vmem:[%s7241_s6 + $0x10] sm:$0xff] }
 0x1bf   : > { %3850 = vmatpush.bf16.msrb.mxu0 %v5706_v38  ;;  %5728 = vmatpush.bf16.msrb.mxu3 %v5706_v38 }
 0x1c0   : > { %v3571_v61 = vadd.f32 %v3570_v55, %v3553_v54  ;;  %v3537_v1 = vadd.f32 %v3536_v59, %v3519_v56  ;;  %3869 = vmatpush.bf16.msrb.mxu1 %v5713_v48  ;;  %v5711_v59 = vld [vmem:[%s7241_s6 + $0x50] sm:$0xff]  ;;  %v5702_v56 = vld [vmem:[%s7241_s6 + $0x8] sm:$0xff]  ;;  %v3697_v48 = vperm.slane %v3592_v43, 1  ;;  %v5724_v43 = vld [vmem:[%s7245_s10 + $0x38] sm:$0xff] }
 0x1c1   : > { %4047 = vmatpush.bf16.msrb.mxu2 %v5724_v43 }
 0x1c2   : > { %v7018_v0 = vadd.f32 %v3582_v57, %v3571_v61 }
 0x1c3   : > { %3851 = vmatpush.bf16.msrb.mxu0 %v5705_v47  ;;  %5729 = vmatpush.bf16.msrb.mxu3 %v5705_v47 }
 0x1c4   : > { %v3593_v63 = vadd.f32 %v7018_v0, %v7016_v60  ;;  %v3613_v4 = vmul.f32 %v7018_v0, %v7018_v0  ;;  %3870 = vmatpush.bf16.msrb.mxu1 %v5712_v51 }
 0x1c5   : > { %v3554_v5 = vpop.f32.mrf.mxu2  ;;  %v3521_v8 = vpop.f32.mrf.mxu0 }
 0x1c6   : > { %v3555_v3 = vadd.f32 %v3554_v5, %v3537_v1  ;;  %v3572_v7 = vpop.f32.mrf.mxu3  ;;  %3594 = vadd.xlane.f32.xlu0 %v3593_v63  ;;  %v3618_v9 = vadd.f32 %v3613_v4, %v3612_v2  ;;  %v3539_v10 = vpop.f32.mrf.mxu1  ;;  %v3522_v13 = vadd.f32 %v3521_v8, %v3504_v6  ;;  %v5701_v5 = vld [vmem:[%s7241_s6] sm:$0xff] }
 0x1c7   : > { %3852 = vmatpush.bf16.msrb.mxu0 %v5704_v50  ;;  %5730 = vmatpush.bf16.msrb.mxu3 %v5704_v50  ;;  %v5709_v6 = vld [vmem:[%s7241_s6 + $0x40] sm:$0xff] }
 0x1c8   : > { %v3573_v12 = vadd.f32 %v3572_v7, %v3555_v3  ;;  %3619 = vadd.xlane.f32.xlu1 %v3618_v9  ;;  %v3540_v15 = vadd.f32 %v3539_v10, %v3522_v13  ;;  %3871 = vmatpush.bf16.msrb.mxu1 %v5711_v59 }
 0x1ca   : > { %v7029_v14 = vadd.f32 %v3582_v57, %v3573_v12 }
 0x1cb   : > { %3853 = vmatpush.bf16.msrb.mxu0 %v5703_v58  ;;  %5731 = vmatpush.bf16.msrb.mxu3 %v5703_v58 }
 0x1cc   : > { %v3596_v18 = vadd.f32 %v7029_v14, %v7027_v11  ;;  %v3615_v16 = vmul.f32 %v7029_v14, %v7029_v14  ;;  %3872 = vmatpush.bf16.msrb.mxu1 %v5710_v62 }
 0x1cd   : > { %v3557_v21 = vpop.f32.mrf.mxu2  ;;  %v3523_v20 = vpop.f32.mrf.mxu0 }
 0x1ce   : > { %v3558_v22 = vadd.f32 %v3557_v21, %v3540_v15  ;;  %v3575_v24 = vpop.f32.mrf.mxu3  ;;  %3597 = vadd.xlane.f32.xlu0 %v3596_v18  ;;  %v3621_v25 = vadd.f32 %v3615_v16, %v3614_v19  ;;  %v3541_v26 = vpop.f32.mrf.mxu1 }
 0x1cf   : > { %3854 = vmatpush.bf16.msrb.mxu0 %v5702_v56  ;;  %5732 = vmatpush.bf16.msrb.mxu3 %v5702_v56 }
 0x1d0   : > { %v3576_v23 = vadd.f32 %v3575_v24, %v3558_v22  ;;  %3622 = vadd.xlane.f32.xlu1 %v3621_v25  ;;  %3873 = vmatpush.bf16.msrb.mxu1 %v5709_v6 }
 0x1d2   : > { %v7040_v29 = vadd.f32 %v3582_v57, %v3576_v23 }
 0x1d3   : > { %3855 = vmatpush.bf16.msrb.mxu0 %v5701_v5  ;;  %5733 = vmatpush.bf16.msrb.mxu3 %v5701_v5 }
 0x1d4   : > { %v3599_v30 = vadd.f32 %v7040_v29, %v7038_v28  ;;  %v3617_v33 = vmul.f32 %v7040_v29, %v7040_v29 }
 0x1d5   : > { %v3559_v31 = vpop.f32.mrf.mxu2 }
 0x1d6   : > { %v3577_v32 = vpop.f32.mrf.mxu3  ;;  %3600 = vadd.xlane.f32.xlu2 %v3599_v30  ;;  %v3624_v35 = vadd.f32 %v3617_v33, %v3616_v34  ;;  %v3591_v31 = vld [vmem:[%s7239_s4] sm:$0x3] }
 0x1d7   : > { %v3685_v27 = vperm.slane %v3591_v31, 0  ;;  %v3686_v41 = vperm.slane %v3591_v31, 1 }
 0x1de   : > { %3625 = vadd.xlane.f32.xlu2 %v3624_v35 }
 0x239   : > { %v3595_v52 = vpop.xlane.xlu0 %3594 }
 0x23a   : > { %v7078_v53 = vmul.f32 %v3608_v49, %v3595_v52 }
 0x23b   : > { %v3620_v54 = vpop.xlane.xlu1 %3619 }
 0x23c   : > { %v3627_v55 = vmul.f32 %v3620_v54, %v3608_v49  ;;  %v3630_v57 = vmul.f32 %v7078_v53, %v7078_v53  ;;  %v3639_v33 = vsub.f32 %v7016_v60, %v7078_v53  ;;  %v3640_v36 = vsub.f32 %v7018_v0, %v7078_v53 }
 0x23e   : > { %v3633_v17 = vsub.f32 %v3627_v55, %v3630_v57 }
 0x240   : > { %v3636_v61 = vmax.f32 %v3633_v17, 0.0 }
 0x241   : > { %v3598_v1 = vpop.xlane.xlu0 %3597 }
 0x242   : > { %v3645_v63 = vadd.f32 1e-05, %v3636_v61  ;;  %v3610_v2 = vmul.f32 %v3608_v49, %v3598_v1 }
 0x243   : > { %v3623_v4 = vpop.xlane.xlu1 %3622 }
 0x244   : > { %5784 = vrsqrt.f32 %v3645_v63  ;;  %v3628_v3 = vmul.f32 %v3623_v4, %v3608_v49  ;;  %v3631_v7 = vmul.f32 %v3610_v2, %v3610_v2  ;;  %vm3654_vm2 = vweird.f32 %v3645_v63 }
 0x245   : > { %v3641_v0 = vsub.f32 %v7027_v11, %v3610_v2  ;;  %v3642_v47 = vsub.f32 %v7029_v14, %v3610_v2 }
 0x246   : > { %v3634_v8 = vsub.f32 %v3628_v3, %v3631_v7 }
 0x248   : > { %v3637_v9 = vmax.f32 %v3634_v8, 0.0 }
 0x249   : > { %v3601_v10 = vpop.xlane.xlu2 %3600 }
 0x24a   : > { %v5785_v12 = vpop.eup %5784  ;;  %v3646_v15 = vadd.f32 1e-05, %v3637_v9  ;;  %v7100_v19 = vmul.f32 %v3608_v49, %v3601_v10 }
 0x24b   : > { %v3649_v13 = vmul.f32 %v5785_v12, %v3645_v63  ;;  %vm3655_vm1 = vweird.f32 %v5785_v12 }
 0x24c   : > { %5786 = vrsqrt.f32 %v3646_v15  ;;  %v3632_v24 = vmul.f32 %v7100_v19, %v7100_v19  ;;  %vm3656_vm3 = vmor %vm3654_vm2, %vm3655_vm1  ;;  %vm3664_vm5 = vweird.f32 %v3646_v15  ;;  %v3643_v6 = vsub.f32 %v7038_v28, %v7100_v19  ;;  %v5778_v28 = vld [vmem:[%s7242_s7] ss:$0 sm:$0xff] }
 0x24d   : > { %v3650_v18 = vmul.f32 %v5785_v12, %v3649_v13  ;;  %v3644_v3 = vsub.f32 %v7040_v29, %v7100_v19 }
 0x24f   : > { %v3651_v16 = vmul.f32 0.5, %v3650_v18 }
 0x251   : > { %v3652_v21 = vsub.f32 1.5, %v3651_v16  ;;  %v3626_v22 = vpop.xlane.xlu2 %3625 }
 0x252   : > { %v3629_v20 = vmul.f32 %v3626_v22, %v3608_v49  ;;  %v5787_v25 = vpop.eup %5786 }
 0x253   : > { %v3653_v26 = vmul.f32 %v5785_v12, %v3652_v21  ;;  %v3659_v23 = vmul.f32 %v5787_v25, %v3646_v15  ;;  %vm3665_vm4 = vweird.f32 %v5787_v25 }
 0x254   : > { %v3635_v30 = vsub.f32 %v3629_v20, %v3632_v24  ;;  %vm3666_vm6 = vmor %vm3664_vm5, %vm3665_vm4 }
 0x255   : > { %v3657_v32 = vsel %vm3656_vm3, %v5785_v12, %v3653_v26  ;;  %v3660_v34 = vmul.f32 %v5787_v25, %v3659_v23 }
 0x256   : > { %v3638_v35 = vmax.f32 %v3635_v30, 0.0  ;;  %v3678_v37 = vmul.f32 %v3657_v32, %v3639_v33  ;;  %v3679_v42 = vmul.f32 %v3657_v32, %v3640_v36 }
 0x257   : > { %v3661_v39 = vmul.f32 0.5, %v3660_v34 }
 0x258   : > { %v3647_v40 = vadd.f32 1e-05, %v3638_v35  ;;  %v3689_v38 = vmul.f32 %v3685_v27, %v3678_v37  ;;  %v3690_v46 = vmul.f32 %v3686_v41, %v3679_v42 }
 0x259   : > { %v3662_v44 = vsub.f32 1.5, %v3661_v39 }
 0x25a   : > { %5788 = vrsqrt.f32 %v3647_v40  ;;  %v3700_v53 = vadd.f32 %v3696_v45, %v3689_v38  ;;  %v3701_v58 = vadd.f32 %v3697_v48, %v3690_v46  ;;  %vm3674_vm8 = vweird.f32 %v3647_v40  ;;  %v5723_v38 = vld [vmem:[%s7245_s10 + $0x30] sm:$0xff] }
 0x25b   : > { %v3663_v60 = vmul.f32 %v5787_v25, %v3662_v44  ;;  %4048 = vmatpush.bf16.msrb.mxu2 %v5723_v38 }
 0x25c   : > { %v3706_v56 = vmax.f32 %v3700_v53, 0.0  ;;  %v3707_v11 = vmax.f32 %v3701_v58, 0.0  ;;  %v5718_v58 = vld [vmem:[%s7245_s10 + $0x8] sm:$0xff] }
 0x25d   : > { %v3667_v49 = vsel %vm3666_vm6, %v5787_v25, %v3663_v60 }
 0x25e   : > { %v3680_v50 = vmul.f32 %v3667_v49, %v3641_v0  ;;  %v3681_v51 = vmul.f32 %v3667_v49, %v3642_v47  ;;  %v5721_v0 = vld [vmem:[%s7245_s10 + $0x20] sm:$0xff] }
 0x260   : > { %v5789_v52 = vpop.eup %5788  ;;  %v3691_v54 = vmul.f32 %v3685_v27, %v3680_v50  ;;  %v3692_v55 = vmul.f32 %v3686_v41, %v3681_v51 }
 0x261   : > { %v3669_v57 = vmul.f32 %v5789_v52, %v3647_v40  ;;  %vm3675_vm7 = vweird.f32 %v5789_v52  ;;  %v5874_v40 = vmov 128.0  }
 0x262   : > { %v3702_v17 = vadd.f32 %v3696_v45, %v3691_v54  ;;  %v3703_v61 = vadd.f32 %v3697_v48, %v3692_v55  ;;  %vm3676_vm9 = vmor %vm3674_vm8, %vm3675_vm7  ;;  %5790 = vrcp.f32 %v5874_v40  ;;  %v5719_v54 = vld [vmem:[%s7245_s10 + $0x10] sm:$0xff] }
 0x263   : > { %v3670_v59 = vmul.f32 %v5789_v52, %v3669_v57 }
 0x264   : > { %v3708_v1 = vmax.f32 %v3702_v17, 0.0  ;;  %v3709_v63 = vmax.f32 %v3703_v61, 0.0 }
 0x265   : > { %v3671_v62 = vmul.f32 0.5, %v3670_v59 }
 0x266   : > { %v3712_v2 = vpack.c.bf16 %v3708_v1, %v3706_v56  ;;  %v3713_v4 = vpack.c.bf16 %v3709_v63, %v3707_v11  ;;  %v5717_v1 = vld [vmem:[%s7245_s10] sm:$0xff] }
 0x267   : > { %v3672_v14 = vsub.f32 1.5, %v3671_v62 }
 0x268   : > { %3856 = vmatmul.bf16.vlgmr.msrb.gmra.mxu0 %v3712_v2  ;;  %3874 = vmatmul.bf16.vlgmr.msrb.gmra.mxu1 %v3713_v4 }
 0x269   : > { %v3673_v5 = vmul.f32 %v5789_v52, %v3672_v14 }
 0x26b   : > { %v3677_v7 = vsel %vm3676_vm9, %v5789_v52, %v3673_v5 }
 0x26c   : > { %v3682_v8 = vmul.f32 %v3677_v7, %v3643_v6  ;;  %v3683_v9 = vmul.f32 %v3677_v7, %v3644_v3 }
 0x26e   : > { %v3693_v10 = vmul.f32 %v3685_v27, %v3682_v8  ;;  %v3694_v12 = vmul.f32 %v3686_v41, %v3683_v9  ;;  %v5791_v41 = vpop.eup %5790 }
 0x26f   : > { %v3893_v42 = vmul.f32 128.0, %v5791_v41  ;;  %vm3897_vm10 = vweird.f32 %v5791_v41 }
 0x270   : > { %v3704_v13 = vadd.f32 %v3696_v45, %v3693_v10  ;;  %v3705_v15 = vadd.f32 %v3697_v48, %v3694_v12  ;;  %v5722_v45 = vld [vmem:[%s7245_s10 + $0x28] sm:$0xff]  ;;  %v5720_v48 = vld [vmem:[%s7245_s10 + $0x18] sm:$0xff] }
 0x271   : > { %v3894_v44 = vsub.f32 1.0, %v3893_v42  ;;  %4049 = vmatpush.bf16.msrb.mxu2 %v5722_v45 }
 0x272   : > { %v3710_v18 = vmax.f32 %v3704_v13, 0.0  ;;  %v3711_v16 = vmax.f32 %v3705_v15, 0.0 }
 0x273   : > { %v3895_v60 = vmul.f32 %v5791_v41, %v3894_v44 }
 0x274   : > { %v3714_v21 = vpack.c.bf16 %v3710_v18, %v3710_v18  ;;  %v3715_v22 = vpack.c.bf16 %v3711_v16, %v3711_v16 }
 0x275   : > { %v3896_v46 = vadd.f32 %v5791_v41, %v3895_v60  ;;  %4050 = vmatpush.bf16.msrb.mxu2 %v5721_v0 }
 0x276   : > { %3861 = vmatmul.bf16.vlgmr.msrb.gmra.mxu3 %v3714_v21 }
 0x277   : > { %v3898_v47 = vsel %vm3897_vm10, %v5791_v41, %v3896_v46 }
 0x278   : > { %3879 = vmatmul.bf16.gmra.mxu1 %v3715_v22 }
 0x279   : > { %4051 = vmatpush.bf16.msrb.mxu2 %v5720_v48 }
 0x27d   : > { %4052 = vmatpush.bf16.msrb.mxu2 %v5719_v54 }
 0x281   : > { %4053 = vmatpush.bf16.msrb.mxu2 %v5718_v58 }
 0x285   : > { %4054 = vmatpush.bf16.msrb.mxu2 %v5717_v1 }
 0x2e5   : > { %v3857_v24 = vpop.f32.mrf.mxu0  ;;  %v3875_v29 = vpop.f32.mrf.mxu1 }
 0x2e6   : > { %v3858_v19 = vadd.f32 %v5778_v28, %v3857_v24 }
 0x2e8   : > { %v7123_v20 = vadd.f32 %v3875_v29, %v3858_v19 }
 0x2ea   : > { %3886 = vadd.xlane.f32.xlu0 %v7123_v20  ;;  %v3902_v25 = vmul.f32 %v7123_v20, %v7123_v20 }
 0x2ec   : > { %3905 = vadd.xlane.f32.xlu2 %v3902_v25 }
 0x2ed   : > { %v3859_v26 = vpop.f32.mrf.mxu0  ;;  %v3877_v23 = vpop.f32.mrf.mxu1 }
 0x2ee   : > { %v3860_v30 = vadd.f32 %v5778_v28, %v3859_v26  ;;  %v5779_v26 = vld [vmem:[%s7243_s8] ss:$0 sm:$0xff] }
 0x2f0   : > { %v7128_v31 = vadd.f32 %v3877_v23, %v3860_v30 }
 0x2f2   : > { %3888 = vadd.xlane.f32.xlu1 %v7128_v31  ;;  %v3903_v32 = vmul.f32 %v7128_v31, %v7128_v31 }
 0x2f4   : > { %3907 = vadd.xlane.f32.xlu0 %v3903_v32 }
 0x2f5   : > { %v3880_v33 = vpop.f32.mrf.mxu1 }
 0x2f9   : > { %v3862_v34 = vpop.f32.mrf.mxu3 }
 0x2fa   : > { %v3863_v35 = vadd.f32 %v5778_v28, %v3862_v34 }
 0x2fc   : > { %v7133_v36 = vadd.f32 %v3880_v33, %v3863_v35 }
 0x2fd   : > { %v3882_v27 = vpop.f32.mrf.mxu1 }
 0x2fe   : > { %3890 = vadd.xlane.f32.xlu1 %v7133_v36  ;;  %v3904_v37 = vmul.f32 %v7133_v36, %v7133_v36 }
 0x300   : > { %3909 = vadd.xlane.f32.xlu2 %v3904_v37 }
 0x301   : > { %v3864_v39 = vpop.f32.mrf.mxu3 }
 0x35d   : > { %v3887_v49 = vpop.xlane.xlu0 %3886 }
 0x35e   : > { %v3899_v50 = vmul.f32 %v3898_v47, %v3887_v49 }
 0x35f   : > { %v3906_v51 = vpop.xlane.xlu2 %3905 }
 0x360   : > { %v3914_v52 = vmul.f32 %v3899_v50, %v3899_v50  ;;  %v3911_v53 = vmul.f32 %v3906_v51, %v3898_v47  ;;  %v3923_v19 = vsub.f32 %v7123_v20, %v3899_v50  ;;  %v5780_v20 = vld [vmem:[%s7244_s9] ss:$0 sm:$0xff] }
 0x362   : > { %v3917_v55 = vsub.f32 %v3911_v53, %v3914_v52  ;;  %v5781_v53 = vld [vmem:[%s7246_s11] ss:$0 sm:$0xff] }
 0x364   : > { %v3920_v57 = vmax.f32 %v3917_v55, 0.0 }
 0x365   : > { %v3889_v59 = vpop.xlane.xlu1 %3888 }
 0x366   : > { %v3926_v17 = vadd.f32 1e-05, %v3920_v57  ;;  %v3900_v61 = vmul.f32 %v3898_v47, %v3889_v59 }
 0x367   : > { %v3908_v56 = vpop.xlane.xlu0 %3907 }
 0x368   : > { %5792 = vrsqrt.f32 %v3926_v17  ;;  %v3915_v62 = vmul.f32 %v3900_v61, %v3900_v61  ;;  %v3912_v11 = vmul.f32 %v3908_v56, %v3898_v47  ;;  %vm3935_vm12 = vweird.f32 %v3926_v17 }
 0x369   : > { %v3924_v35 = vsub.f32 %v7128_v31, %v3900_v61 }
 0x36a   : > { %v3918_v63 = vsub.f32 %v3912_v11, %v3915_v62 }
 0x36c   : > { %v3921_v14 = vmax.f32 %v3918_v63, 0.0 }
 0x36e   : > { %v5793_v2 = vpop.eup %5792  ;;  %v3927_v5 = vadd.f32 1e-05, %v3921_v14 }
 0x36f   : > { %v3930_v4 = vmul.f32 %v5793_v2, %v3926_v17  ;;  %vm3936_vm11 = vweird.f32 %v5793_v2 }
 0x370   : > { %5794 = vrsqrt.f32 %v3927_v5  ;;  %vm3937_vm13 = vmor %vm3935_vm12, %vm3936_vm11  ;;  %vm3945_vm15 = vweird.f32 %v3927_v5 }
 0x371   : > { %v3891_v6 = vpop.xlane.xlu1 %3890  ;;  %v3931_v3 = vmul.f32 %v5793_v2, %v3930_v4 }
 0x372   : > { %v3901_v7 = vmul.f32 %v3898_v47, %v3891_v6 }
 0x373   : > { %v3910_v8 = vpop.xlane.xlu2 %3909  ;;  %v3932_v9 = vmul.f32 0.5, %v3931_v3 }
 0x374   : > { %v3916_v10 = vmul.f32 %v3901_v7, %v3901_v7  ;;  %v3913_v12 = vmul.f32 %v3910_v8, %v3898_v47  ;;  %v3925_v31 = vsub.f32 %v7133_v36, %v3901_v7 }
 0x375   : > { %v3933_v13 = vsub.f32 1.5, %v3932_v9 }
 0x376   : > { %v3919_v15 = vsub.f32 %v3913_v12, %v3916_v10  ;;  %v5795_v18 = vpop.eup %5794 }
 0x377   : > { %v3934_v16 = vmul.f32 %v5793_v2, %v3933_v13  ;;  %v3940_v22 = vmul.f32 %v5795_v18, %v3927_v5  ;;  %vm3946_vm14 = vweird.f32 %v5795_v18 }
 0x378   : > { %v3922_v21 = vmax.f32 %v3919_v15, 0.0  ;;  %vm3947_vm0 = vmor %vm3945_vm15, %vm3946_vm14 }
 0x379   : > { %v3938_v24 = vsel %vm3937_vm13, %v5793_v2, %v3934_v16  ;;  %v3941_v29 = vmul.f32 %v5795_v18, %v3940_v22 }
 0x37a   : > { %v3928_v28 = vadd.f32 1e-05, %v3922_v21  ;;  %v3959_v23 = vmul.f32 %v3938_v24, %v3923_v19 }
 0x37b   : > { %v3942_v25 = vmul.f32 0.5, %v3941_v29 }
 0x37c   : > { %5796 = vrsqrt.f32 %v3928_v28  ;;  %v3965_v34 = vmul.f32 %v5779_v26, %v3959_v23  ;;  %vm3955_vm2 = vweird.f32 %v3928_v28 }
 0x37d   : > { %v3943_v30 = vsub.f32 1.5, %v3942_v25 }
 0x37e   : > { %v3971_v42 = vadd.f32 %v5780_v20, %v3965_v34 }
 0x37f   : > { %v3944_v32 = vmul.f32 %v5795_v18, %v3943_v30 }
 0x380   : > { %v3974_v60 = vmax.f32 %v3971_v42, 0.0 }
 0x381   : > { %v3948_v27 = vsel %vm3947_vm0, %v5795_v18, %v3944_v32 }
 0x382   : > { %v5797_v33 = vpop.eup %5796  ;;  %v3960_v39 = vmul.f32 %v3948_v27, %v3924_v35 }
 0x383   : > { %v3950_v37 = vmul.f32 %v5797_v33, %v3928_v28  ;;  %vm3956_vm1 = vweird.f32 %v5797_v33 }
 0x384   : > { %v3966_v41 = vmul.f32 %v5779_v26, %v3960_v39  ;;  %vm3957_vm3 = vmor %vm3955_vm2, %vm3956_vm1 }
 0x385   : > { %v3951_v40 = vmul.f32 %v5797_v33, %v3950_v37 }
 0x386   : > { %v3972_v44 = vadd.f32 %v5780_v20, %v3966_v41 }
 0x387   : > { %v3952_v43 = vmul.f32 0.5, %v3951_v40 }
 0x388   : > { %v3975_v45 = vmax.f32 %v3972_v44, 0.0 }
 0x389   : > { %v3953_v38 = vsub.f32 1.5, %v3952_v43 }
 0x38a   : > { %v3977_v0 = vpack.c.bf16 %v3975_v45, %v3974_v60 }
 0x38b   : > { %v3954_v46 = vmul.f32 %v5797_v33, %v3953_v38 }
 0x38c   : > { %4055 = vmatmul.bf16.vlgmr.msrb.gmra.mxu2 %v3977_v0 }
 0x38d   : > { %v3958_v47 = vsel %vm3957_vm3, %v5797_v33, %v3954_v46 }
 0x38e   : > { %v3961_v48 = vmul.f32 %v3958_v47, %v3925_v31 }
 0x390   : > { %v3967_v49 = vmul.f32 %v5779_v26, %v3961_v48 }
 0x392   : > { %v3973_v50 = vadd.f32 %v5780_v20, %v3967_v49 }
 0x394   : > { %v3976_v51 = vmax.f32 %v3973_v50, 0.0 }
 0x396   : > { %v3978_v52 = vpack.c.bf16 %v3976_v51, %v3976_v51 }
 0x39c   : > { %4060 = vmatmul.bf16.gmra.mxu2 %v3978_v52 }
 0x40f   : > { %v4056_v54 = vpop.f32.mrf.mxu2 }
 0x410   : > { %v4057_v55 = vadd.f32 %v5781_v53, %v4056_v54 }
 0x412   : > { %4065 = vst [vmem:[%s424_s20] sm:$0xff] %v4057_v55 }
 0x417   : > { %v4058_v36 = vpop.f32.mrf.mxu2 }
 0x418   : > { %v4059_v57 = vadd.f32 %v5781_v53, %v4058_v36 }
 0x41a   : > { %4066 = vst [vmem:[%s424_s20 + $0x8] sm:$0xff] %v4059_v57 }
 0x41f   : > { %v4061_v58 = vpop.f32.mrf.mxu2 }
 0x420   : > { %v4062_v59 = vadd.f32 %v5781_v53, %v4061_v58 }
 0x422   : > { %4067 = vst [vmem:[%s424_s20 + $0x10] sm:$0xff] %v4062_v59 }
 0x423   : > { %4075 = sbr.rel (!%p5981_p5) target bundleno = 1096 (0x448), region = 72 }
 0x427   : > { %v4063_v17 = vpop.f32.mrf.mxu2 }
 0x428   : > { %s7270_s26 = smov (!%p4078_p11, %s4077_s26), 3 }
 0x429   : > { %s5406_s14 = sshll.u32 %s7270_s26, 3 }
 0x42a   : > { %s4081_s29 = ssub.s32 24, %s5406_s14 }
 0x42b   : > { %s4082_s16 = sshll.u32 %s4081_s29, 4 }
 0x42c   : > { %4083 = vsyncadd %s7175_s27, %s4082_s16  ;;  %p7184_p12 = scmp.ne.s32.totalorder %s5406_s14, 0  ;;  %s5725_s13 = smul.u32 24, %s5964_s25 }
 0x42d   : > { %s4088_s28 = sshll.u32 %s424_s20, 4  ;;  %s7252_s23 = sshll.u32 %s7270_s26, 7  ;;  %s7193_s28 = int_to_ptr.vmem [resolvable:$true] %s4088_s28 }
 0x42e   : > { %s4086_s19 = scalar_lea.hbm %s7247_s12, %s5725_s13  ;;  %s5798_s29 = sshra.s32 %s7193_s28, 4  ;;  %s5799_s29 = int_to_ptr.vmem [resolvable:$true] %s5798_s29 }
 0x42f   : > { %s4090_s30 = sshll.u32 %s4086_s19, 4  ;;  %s5800_s14 = sshrl.u32 %s7252_s23, 4  ;;  %s7195_s30 = int_to_ptr.hbm [resolvable:$true] %s4090_s30 }
 0x430   : > { %s5805_s16 = scalar_lea.vmem %s5799_s29, %s5800_s14  ;;  %s5875_s25 = smov [#allocation2]  }
 0x431   : > { %p5806_p13 = scmp.ne.s32.totalorder %s5799_s29, %s5805_s16  ;;  %s5809_s20 = scalar_lea.vmem %s5875_s25, 48 }
 0x432   : > { %p5811_p2 = scmp.lt.s32.totalorder %s5809_s20, %s5805_s16 }
 0x433   : > { %p5807_p0 = pnand %p5806_p13, %p7184_p12 }
 0x435   : > { %p5808_p1 = pneg %p5807_p0 }
 0x437   : > { %p5813_p3 = pnand %p5811_p2, %p5808_p1 }
 0x439   : > { %5816 = shalt.err (!%p5813_p3)
}
 0x43a   : > { %s5817_s13 = sshra.s32 %s7195_s30, 4  ;;  %s5828_s29 = scalar_lea.hbm %s7247_s12, 40  ;;  %s5818_s13 = int_to_ptr.hbm [resolvable:$true] %s5817_s13 }
 0x43b   : > { %s5824_s15 = scalar_lea.hbm %s5818_s13, %s5800_s14  ;;  %p5829_p8 = scmp.lt.s32.totalorder %s5818_s13, %s7247_s12 }
 0x43c   : > { %p5825_p4 = scmp.ne.s32.totalorder %s5818_s13, %s5824_s15  ;;  %p5830_p9 = scmp.lt.s32.totalorder %s5828_s29, %s5824_s15 }
 0x43e   : > { %p5826_p5 = pnand %p5825_p4, %p7184_p12  ;;  %p5831_p10 = por %p5830_p9, %p5829_p8 }
 0x440   : > { %p5827_p7 = pneg %p5826_p5 }
 0x442   : > { %p5832_p11 = pnand %p5831_p10, %p5827_p7 }
 0x444   : > { %5835 = shalt.err (!%p5832_p11)
}
 0x445   : > { %s5876_s16 = smov 128   ;;  %s5877_s14 = smov 8  }
 0x446   : > { %s7262_s25 = sshll.u32 %s7270_s26, 7 }
 0x447   : > { %4096 = dma.vmem_to_hbm [thread:$0]  (%p7184_p12), %s7193_s28, %s7262_s25, %s7195_s30, %s7175_s27, %s5876_s16, %s5876_s16, %s5877_s14  }
 0x448 PF: > { %p5741_p13 = scmp.ge.s32.totalorder %s5871_s24, 2  ;;  %s4105_s23 = sand.u32 1, %s5859_s21  }
 0x449   : > { %s4106_s20 = scalar_lea.sflag [#allocation3], %s4105_s23 }
 0x44a   : > { %p5738_p0 = pnand %p5741_p13, %p5985_p6 }
 0x44c   : > { %p5739_p1 = pneg %p5738_p0 }
 0x44e   : > { %5854 = dma.done.wait (%p5739_p1), %s4106_s20, 384  }
 0x44f   : > { %5856 = vsyncadd (%p5739_p1), %s4106_s20, 4294966912  ;;  %s7264_s24 = sld [smem:[#allocation6_spill]]  ;;  %s7267_s21 = smov %s5863_s22 }
 0x450   : > { %s7265_s13 = sld [smem:[#allocation5_spill]] }
 0x451   : > { %s7266_s23 = sld [smem:[#allocation7_spill]] }
 0x455   : > { %p22_p2 = scmp.ge.s32.totalorder %s7264_s24, 4  }
 0x456   : > { %s7268_s22 = smov %s7265_s13 }
 0x457   :  { %24 = sbr.rel (!%p22_p2) target bundleno = 5 (0x5), region = 103 }
 0x45c   :  { %4112 = vsyncpa [#allocation3], 1 }
 0x45d   :  { %4114 = vsyncpa [#allocation3 + $0x1], 1 }

</bundles_post_ra>
